<compile_context>
chip_gen: v6e
topology: v6e:2x2x1
jax: 0.10.0
libtpu: 0.0.40
codegen_flags: <defaults>
</compile_context>

<pallas_src>
import functools
import math

import jax
import jax.numpy as jnp
import numpy as np
from jax.experimental import pallas as pl
from jax.experimental.pallas import tpu as pltpu

EMBED_DIM = 32
NUM_HEADS = 4
LENGTHS = (8, 5)          # nodes per batch element -> B=2, max_len=8
NEG_INF = -1e20
LANE = 128                # TPU vreg lane width; Q/K/V weight blocks aligned to it


# ------------------------------ Pallas kernel --------------------------------
def relation_mhsa_maxpool_kernel(x_ref, rel_ref, mbias_ref, wqkv_ref, wfc_ref,
                                 bfc_ref, exp_dh_ref, exp_hd_ref, o_ref, *,
                                 nhead):
    B, S, D = x_ref.shape
    scale = 1.0 / math.sqrt(D)            # PyTorch divides energy by sqrt(embed_size)

    x = x_ref[...]                        # (B, S, D)    padded embeddings
    rel = rel_ref[...]                    # (B, S, S, D) relation tensor

    # Relation pooling.  The (H, hd) head split is just a lane split of D, so we
    # stay in the flat (.., D) layout throughout (no head-major relayouts).
    row_pool = jnp.max(rel, axis=2)       # max over key dim   (torch dim=-3) -> (B, S, D)
    col_pool = jnp.max(rel, axis=1)       # max over query dim (torch dim=-4) -> (B, S, D)

    # Fused per-head Q/K/V projections at M = B*S.  wqkv is (D, 3*128) with the
    # block-diagonal kron(I_H, W^T) sub-blocks starting at lanes 0/128/256, so the
    # column slices below are 128-lane aligned (no lane rotations).
    xf = x.reshape(B * S, D)
    qkv = jnp.dot(xf, wqkv_ref[...], preferred_element_type=jnp.float32)   # (B*S, 3*128)
    q = qkv[:, 0:D].reshape(B, S, D)
    k = qkv[:, LANE:LANE + D].reshape(B, S, D)
    v = qkv[:, 2 * LANE:2 * LANE + D]     # (B*S, D), kept flat for fc_out

    qwr = (q + row_pool) * scale          # softmax scale folded into the Q side
    kwr = k + col_pool

    # Energies in the native lane layout: (q, k) outer product on the VPU, then
    # one tiny matmul against the (D, H) head indicator to reduce each head's hd
    # lanes -> (B*S*S, H).  No per-head matmuls, no transposes.
    prod = qwr[:, :, None, :] * kwr[:, None, :, :]             # (B, S, S, D)
    energy = jnp.dot(prod.reshape(B * S * S, D), exp_dh_ref[...],
                     preferred_element_type=jnp.float32)       # (B*S*S, H)

    # Additive mask bias (0 / -1e20), broadcast over heads.  (The reference masks
    # *before* the 1/sqrt(D) scale; both saturate exp() to 0 identically, and
    # fully-masked padded rows become uniform softmax rows in both.)
    energy = energy + mbias_ref[...]                           # bias is (B*S*S, 1)

    # Numerically stable softmax over the key axis.
    # NOTE: its row-sum is mathematically 1 for every (head, query) row -- the
    # module's einsum 'nhqk,nqhd->nqhd' contracts only k, so this chain is an
    # identity scale on v.  Kept, with exact division, for step-faithfulness.
    e4 = energy.reshape(B, S, S, nhead)
    e4 = e4 - jnp.max(e4, axis=2, keepdims=True)
    p = jnp.exp(e4)
    attn = p / jnp.sum(p, axis=2, keepdims=True)
    rowsum = jnp.sum(attn, axis=2)                             # (B, S, H) ~= 1.0

    # Broadcast the (head, query) row-sum across each head's lanes with one tiny
    # matmul against the constant (H, D) expansion (no per-head slicing/concat).
    rs_full = jnp.dot(rowsum.reshape(B * S, nhead), exp_hd_ref[...],
                      preferred_element_type=jnp.float32)      # (B*S, D)
    attended = v * rs_full

    # fc_out + bias, then F.max_pool1d over the sequence axis.  Padded rows still
    # contribute the fc_out bias to the max, exactly as in the PyTorch module.
    y = jnp.dot(attended, wfc_ref[...],
                preferred_element_type=jnp.float32) + bfc_ref[...]         # (B*S, D)
    o_ref[...] = jnp.max(y.reshape(B, S, D), axis=1)                       # (B, D)


# ------------------------------ wrapper ---------------------------------------
def _full_spec(shape):
    nd = len(shape)
    return pl.BlockSpec(shape, lambda i, _nd=nd: (0,) * _nd)


def maxpool_relation_mhsa(padded_emb, padded_rel, mask_bias, packed, nhead):
    """padded_emb (B,S,D), padded_rel (B,S,S,D), mask_bias (B*S*S,1) -> (B, D)."""
    B, S, D = padded_emb.shape
    inputs = (padded_emb, padded_rel, mask_bias, packed["wqkv"], packed["wfc_t"],
              packed["bfc"], packed["exp_dh"], packed["exp_hd"])
    # Single grid step: the whole problem (~70 KiB incl. weights) is trivially
    # VMEM-resident on every TPU generation; a per-batch grid would be pure
    # per-step overhead at these shapes.
    # TODO(synk): if S/D ever grow, tile padded_rel over the query axis
    # (grid=(B, S//tq)), keep the key-axis row_pool in-kernel and accumulate
    # col_pool in VMEM scratch; size tq against v7x's 64 MiB VMEM.
    return pl.pallas_call(
        functools.partial(relation_mhsa_maxpool_kernel, nhead=nhead),
        out_shape=jax.ShapeDtypeStruct((B, D), jnp.float32),
        grid=(1,),
        in_specs=[_full_spec(a.shape) for a in inputs],
        out_specs=pl.BlockSpec((B, D), lambda i: (0, 0)),
        compiler_params=pltpu.CompilerParams(dimension_semantics=("arbitrary",)),
    )(*inputs)


# ------------------------------ params ----------------------------------------
def init_params(key, d_model, nhead):
    """PyTorch-style init.  NOTE: self.relations Linear is unused in forward -> omitted."""
    hd = d_model // nhead
    ks = jax.random.split(key, 5)
    u = lambda k, shape, b: jax.random.uniform(k, shape, jnp.float32, -b, b)
    s_hd = 1.0 / math.sqrt(hd)
    s_d = 1.0 / math.sqrt(d_model)
    return {
        "wq": u(ks[0], (hd, hd), s_hd),
        "wk": u(ks[1], (hd, hd), s_hd),
        "wv": u(ks[2], (hd, hd), s_hd),
        "wfc": u(ks[3], (d_model, d_model), s_d),
        "bfc": u(ks[4], (d_model,), s_d),
    }


def pack_params(p, nhead):
    """One-time host-side weight transform into the fused-kernel layout."""
    hd = p["wq"].shape[0]
    d = nhead * hd
    eye = jnp.eye(nhead, dtype=jnp.float32)
    # Q/K/V block-diagonal weights start on 128-lane boundaries so the in-kernel
    # column slices of the fused projection are lane-0 aligned (free).  The extra
    # zero columns are free: the MXU pads N to its native width anyway.
    wqkv = jnp.zeros((d, 3 * LANE), jnp.float32)
    wqkv = wqkv.at[:, 0:d].set(jnp.kron(eye, p["wq"].T))
    wqkv = wqkv.at[:, LANE:LANE + d].set(jnp.kron(eye, p["wk"].T))
    wqkv = wqkv.at[:, 2 * LANE:2 * LANE + d].set(jnp.kron(eye, p["wv"].T))
    expand_hd = jnp.kron(eye, jnp.ones((1, hd), jnp.float32))   # (H, D) head indicator
    return {"wqkv": wqkv, "wfc_t": p["wfc"].T, "bfc": p["bfc"].reshape(1, d),
            "exp_hd": expand_hd, "exp_dh": expand_hd.T}


# ------------------------------ pure-JAX reference ----------------------------
def ref_forward(padded_emb, padded_rel, mask, params, nhead):
    """Faithful port of RelationMultiHeadSelfAttention + max_pool1d (PyTorch order)."""
    B, S, D = padded_emb.shape
    hd = D // nhead
    e4 = padded_emb.reshape(B, S, nhead, hd)
    r5 = padded_rel.reshape(B, S, S, nhead, hd)
    row_pool = jnp.max(r5, axis=2)
    col_pool = jnp.max(r5, axis=1)
    v = jnp.einsum('bshd,ed->bshe', e4, params["wv"])
    k = jnp.einsum('bshd,ed->bshe', e4, params["wk"])
    q = jnp.einsum('bshd,ed->bshe', e4, params["wq"])
    energy = jnp.einsum('bqhd,bkhd->bhqk', q + row_pool, k + col_pool)
    energy = jnp.where(mask[:, None, :, :] == 1.0, NEG_INF, energy)
    attn = jax.nn.softmax(energy / math.sqrt(D), axis=3)
    out = jnp.einsum('bhqk,bqhd->bqhd', attn, v).reshape(B, S, D)
    out = out @ params["wfc"].T + params["bfc"]
    return jnp.max(out, axis=1)


# ------------------------------ main -------------------------------------------
if __name__ == "__main__":
    key = jax.random.PRNGKey(0)
    k_emb, k_rel, k_par = jax.random.split(key, 3)

    B = len(LENGTHS)
    S = max(LENGTHS)
    D, H = EMBED_DIM, NUM_HEADS
    total = sum(LENGTHS)

    embeddings = jax.random.normal(k_emb, (total, D), jnp.float32)       # (13, 32)
    relation = jax.random.normal(k_rel, (B, S, S, D), jnp.float32)       # (2, 8, 8, 32)
    batch_vec = np.concatenate([np.full(n, i, np.int32)
                                for i, n in enumerate(LENGTHS)])          # (13,)

    # TODO(synk): the data-dependent padding/grouping over batch.unique() has no
    # clean Pallas equivalent (dynamic shapes); it is replicated host-side here.
    emb_np = np.zeros((B, S, D), np.float32)
    mask_np = np.ones((B, S, S), np.float32)
    emb_host = np.asarray(embeddings)
    for i in range(B):
        idx = np.where(batch_vec == i)[0]
        n = idx.size
        emb_np[i, :n] = emb_host[idx]
        mask_np[i, :n, :n] = 0.0
    padded_emb = jnp.asarray(emb_np)
    mask = jnp.asarray(mask_np)
    # Precompute the mask as an additive bias (0 / -1e20), flat (B*S*S, 1).
    mask_bias = jnp.asarray(
        np.where(mask_np == 1.0, NEG_INF, 0.0).astype(np.float32).reshape(B * S * S, 1))

    params = init_params(k_par, D, H)
    packed = pack_params(params, H)

    out = maxpool_relation_mhsa(padded_emb, relation, mask_bias, packed, H)
    out = jax.block_until_ready(out)

    ref = jax.block_until_ready(ref_forward(padded_emb, relation, mask, params, H))
    np.testing.assert_allclose(np.asarray(out), np.asarray(ref), rtol=1e-3, atol=1e-3)
    assert out.shape == (B, D)

    print("KERNEL_OK")
</pallas_src>

<mosaic_0001>
module attributes {stable_mosaic.version = 11 : i64} {
  func.func @relation_mhsa_maxpool_kernel(%arg0: i32, %arg1: memref<2x8x32xf32, #tpu.memory_space<vmem>>, %arg2: memref<2x8x8x32xf32, #tpu.memory_space<vmem>>, %arg3: memref<128x1xf32, #tpu.memory_space<vmem>>, %arg4: memref<32x384xf32, #tpu.memory_space<vmem>>, %arg5: memref<32x32xf32, #tpu.memory_space<vmem>>, %arg6: memref<1x32xf32, #tpu.memory_space<vmem>>, %arg7: memref<32x4xf32, #tpu.memory_space<vmem>>, %arg8: memref<4x32xf32, #tpu.memory_space<vmem>>, %arg9: memref<2x32xf32, #tpu.memory_space<vmem>>) attributes {dimension_semantics = [#tpu.dimension_semantics<arbitrary>], iteration_bounds = array<i64: 1>, scalar_prefetch = 0 : i64, scratch_operands = 0 : i64, tpu.core_type = #tpu.core_type<tc>, window_params = [{pipeline_mode = #tpu.pipeline_mode<synchronous>, transform_indices = @transform_0, window_bounds = array<i64: 2, 8, 32>}, {pipeline_mode = #tpu.pipeline_mode<synchronous>, transform_indices = @transform_1, window_bounds = array<i64: 2, 8, 8, 32>}, {pipeline_mode = #tpu.pipeline_mode<synchronous>, transform_indices = @transform_2, window_bounds = array<i64: 128, 1>}, {pipeline_mode = #tpu.pipeline_mode<synchronous>, transform_indices = @transform_3, window_bounds = array<i64: 32, 384>}, {pipeline_mode = #tpu.pipeline_mode<synchronous>, transform_indices = @transform_4, window_bounds = array<i64: 32, 32>}, {pipeline_mode = #tpu.pipeline_mode<synchronous>, transform_indices = @transform_5, window_bounds = array<i64: 1, 32>}, {pipeline_mode = #tpu.pipeline_mode<synchronous>, transform_indices = @transform_6, window_bounds = array<i64: 32, 4>}, {pipeline_mode = #tpu.pipeline_mode<synchronous>, transform_indices = @transform_7, window_bounds = array<i64: 4, 32>}, {pipeline_mode = #tpu.pipeline_mode<synchronous>, transform_indices = @transform_8, window_bounds = array<i64: 2, 32>}]} {
    %c0 = arith.constant 0 : index
    %c0_0 = arith.constant 0 : index
    %c0_1 = arith.constant 0 : index
    %0 = vector.load %arg1[%c0, %c0_0, %c0_1] : memref<2x8x32xf32, #tpu.memory_space<vmem>>, vector<2x8x32xf32>
    %c0_2 = arith.constant 0 : index
    %c0_3 = arith.constant 0 : index
    %c0_4 = arith.constant 0 : index
    %c0_5 = arith.constant 0 : index
    %1 = vector.load %arg2[%c0_2, %c0_3, %c0_4, %c0_5] : memref<2x8x8x32xf32, #tpu.memory_space<vmem>>, vector<2x8x8x32xf32>
    %cst = arith.constant dense<0xFF800000> : vector<2x8x32xf32>
    %2 = vector.multi_reduction <maximumf>, %1, %cst [2] : vector<2x8x8x32xf32> to vector<2x8x32xf32>
    %cst_6 = arith.constant dense<0xFF800000> : vector<2x8x32xf32>
    %3 = vector.multi_reduction <maximumf>, %1, %cst_6 [1] : vector<2x8x8x32xf32> to vector<2x8x32xf32>
    %4 = vector.shape_cast %0 : vector<2x8x32xf32> to vector<16x32xf32>
    %c0_7 = arith.constant 0 : index
    %c0_8 = arith.constant 0 : index
    %5 = vector.load %arg4[%c0_7, %c0_8] : memref<32x384xf32, #tpu.memory_space<vmem>>, vector<32x384xf32>
    %cst_9 = arith.constant dense<0.000000e+00> : vector<16x384xf32>
    %6 = tpu.matmul %4, %5, %cst_9 {dimension_numbers = #tpu.dot_dimension_numbers<[1], [0], [0], [1], [0, 0, 1, 1], [], []>} : vector<16x32xf32>, vector<32x384xf32>, vector<16x384xf32> -> vector<16x384xf32>
    %7 = vector.extract_strided_slice %6 {offsets = [0, 0], sizes = [16, 32], strides = [1, 1]} : vector<16x384xf32> to vector<16x32xf32>
    %8 = vector.shape_cast %7 : vector<16x32xf32> to vector<2x8x32xf32>
    %9 = vector.extract_strided_slice %6 {offsets = [0, 128], sizes = [16, 32], strides = [1, 1]} : vector<16x384xf32> to vector<16x32xf32>
    %10 = vector.shape_cast %9 : vector<16x32xf32> to vector<2x8x32xf32>
    %11 = vector.extract_strided_slice %6 {offsets = [0, 256], sizes = [16, 32], strides = [1, 1]} : vector<16x384xf32> to vector<16x32xf32>
    %12 = arith.addf %8, %2 : vector<2x8x32xf32>
    %cst_10 = arith.constant 0.176776692 : f32
    %13 = vector.broadcast %cst_10 : f32 to vector<2x8x32xf32>
    %14 = arith.mulf %12, %13 : vector<2x8x32xf32>
    %15 = arith.addf %10, %3 : vector<2x8x32xf32>
    %16 = vector.shape_cast %14 : vector<2x8x32xf32> to vector<2x8x1x32xf32>
    %17 = vector.shape_cast %15 : vector<2x8x32xf32> to vector<2x1x8x32xf32>
    %18 = vector.broadcast %16 : vector<2x8x1x32xf32> to vector<2x8x8x32xf32>
    %19 = vector.broadcast %17 : vector<2x1x8x32xf32> to vector<2x8x8x32xf32>
    %20 = arith.mulf %18, %19 : vector<2x8x8x32xf32>
    %21 = vector.shape_cast %20 : vector<2x8x8x32xf32> to vector<128x32xf32>
    %c0_11 = arith.constant 0 : index
    %c0_12 = arith.constant 0 : index
    %22 = vector.load %arg7[%c0_11, %c0_12] : memref<32x4xf32, #tpu.memory_space<vmem>>, vector<32x4xf32>
    %cst_13 = arith.constant dense<0.000000e+00> : vector<128x4xf32>
    %23 = tpu.matmul %21, %22, %cst_13 {dimension_numbers = #tpu.dot_dimension_numbers<[1], [0], [0], [1], [0, 0, 1, 1], [], []>} : vector<128x32xf32>, vector<32x4xf32>, vector<128x4xf32> -> vector<128x4xf32>
    %c0_14 = arith.constant 0 : index
    %c0_15 = arith.constant 0 : index
    %24 = vector.load %arg3[%c0_14, %c0_15] : memref<128x1xf32, #tpu.memory_space<vmem>>, vector<128x1xf32>
    %25 = vector.broadcast %24 : vector<128x1xf32> to vector<128x4xf32>
    %26 = arith.addf %23, %25 : vector<128x4xf32>
    %27 = vector.shape_cast %26 : vector<128x4xf32> to vector<2x8x8x4xf32>
    %cst_16 = arith.constant dense<0xFF800000> : vector<2x8x4xf32>
    %28 = vector.multi_reduction <maximumf>, %27, %cst_16 [2] : vector<2x8x8x4xf32> to vector<2x8x4xf32>
    %29 = vector.shape_cast %28 : vector<2x8x4xf32> to vector<2x8x1x4xf32>
    %30 = vector.broadcast %29 : vector<2x8x1x4xf32> to vector<2x8x8x4xf32>
    %31 = arith.subf %27, %30 : vector<2x8x8x4xf32>
    %32 = math.exp %31 : vector<2x8x8x4xf32>
    %cst_17 = arith.constant dense<0.000000e+00> : vector<2x8x4xf32>
    %33 = vector.multi_reduction <add>, %32, %cst_17 [2] : vector<2x8x8x4xf32> to vector<2x8x4xf32>
    %34 = vector.shape_cast %33 : vector<2x8x4xf32> to vector<2x8x1x4xf32>
    %35 = vector.broadcast %34 : vector<2x8x1x4xf32> to vector<2x8x8x4xf32>
    %36 = arith.divf %32, %35 : vector<2x8x8x4xf32>
    %cst_18 = arith.constant dense<0.000000e+00> : vector<2x8x4xf32>
    %37 = vector.multi_reduction <add>, %36, %cst_18 [2] : vector<2x8x8x4xf32> to vector<2x8x4xf32>
    %38 = vector.shape_cast %37 : vector<2x8x4xf32> to vector<16x4xf32>
    %c0_19 = arith.constant 0 : index
    %c0_20 = arith.constant 0 : index
    %39 = vector.load %arg8[%c0_19, %c0_20] : memref<4x32xf32, #tpu.memory_space<vmem>>, vector<4x32xf32>
    %cst_21 = arith.constant dense<0.000000e+00> : vector<16x32xf32>
    %40 = tpu.matmul %38, %39, %cst_21 {dimension_numbers = #tpu.dot_dimension_numbers<[1], [0], [0], [1], [0, 0, 1, 1], [], []>} : vector<16x4xf32>, vector<4x32xf32>, vector<16x32xf32> -> vector<16x32xf32>
    %41 = arith.mulf %11, %40 : vector<16x32xf32>
    %c0_22 = arith.constant 0 : index
    %c0_23 = arith.constant 0 : index
    %42 = vector.load %arg5[%c0_22, %c0_23] : memref<32x32xf32, #tpu.memory_space<vmem>>, vector<32x32xf32>
    %cst_24 = arith.constant dense<0.000000e+00> : vector<16x32xf32>
    %43 = tpu.matmul %41, %42, %cst_24 {dimension_numbers = #tpu.dot_dimension_numbers<[1], [0], [0], [1], [0, 0, 1, 1], [], []>} : vector<16x32xf32>, vector<32x32xf32>, vector<16x32xf32> -> vector<16x32xf32>
    %c0_25 = arith.constant 0 : index
    %c0_26 = arith.constant 0 : index
    %44 = vector.load %arg6[%c0_25, %c0_26] : memref<1x32xf32, #tpu.memory_space<vmem>>, vector<1x32xf32>
    %45 = vector.broadcast %44 : vector<1x32xf32> to vector<16x32xf32>
    %46 = arith.addf %43, %45 : vector<16x32xf32>
    %47 = vector.shape_cast %46 : vector<16x32xf32> to vector<2x8x32xf32>
    %cst_27 = arith.constant dense<0xFF800000> : vector<2x32xf32>
    %48 = vector.multi_reduction <maximumf>, %47, %cst_27 [1] : vector<2x8x32xf32> to vector<2x32xf32>
    %c0_28 = arith.constant 0 : index
    %c0_29 = arith.constant 0 : index
    %49 = vector.load %arg9[%c0_28, %c0_29] : memref<2x32xf32, #tpu.memory_space<vmem>>, vector<2x32xf32>
    tpu.vector_store %arg9[%c0_28, %c0_29], %48 {strides = array<i32>} : memref<2x32xf32, #tpu.memory_space<vmem>>, vector<2x32xf32>,
    return
  }
  func.func @transform_0(%arg0: i32) -> (i32, i32, i32) {
    %c0_i32 = arith.constant 0 : i32
    %c0_i32_0 = arith.constant 0 : i32
    %c0_i32_1 = arith.constant 0 : i32
    %c0_i32_2 = arith.constant 0 : i32
    return %c0_i32, %c0_i32_0, %c0_i32_1 : i32, i32, i32
  }
  func.func @transform_1(%arg0: i32) -> (i32, i32, i32, i32) {
    %c0_i32 = arith.constant 0 : i32
    %c0_i32_0 = arith.constant 0 : i32
    %c0_i32_1 = arith.constant 0 : i32
    %c0_i32_2 = arith.constant 0 : i32
    %c0_i32_3 = arith.constant 0 : i32
    return %c0_i32, %c0_i32_0, %c0_i32_1, %c0_i32_2 : i32, i32, i32, i32
  }
  func.func @transform_2(%arg0: i32) -> (i32, i32) {
    %c0_i32 = arith.constant 0 : i32
    %c0_i32_0 = arith.constant 0 : i32
    %c0_i32_1 = arith.constant 0 : i32
    return %c0_i32, %c0_i32_0 : i32, i32
  }
  func.func @transform_3(%arg0: i32) -> (i32, i32) {
    %c0_i32 = arith.constant 0 : i32
    %c0_i32_0 = arith.constant 0 : i32
    %c0_i32_1 = arith.constant 0 : i32
    return %c0_i32, %c0_i32_0 : i32, i32
  }
  func.func @transform_4(%arg0: i32) -> (i32, i32) {
    %c0_i32 = arith.constant 0 : i32
    %c0_i32_0 = arith.constant 0 : i32
    %c0_i32_1 = arith.constant 0 : i32
    return %c0_i32, %c0_i32_0 : i32, i32
  }
  func.func @transform_5(%arg0: i32) -> (i32, i32) {
    %c0_i32 = arith.constant 0 : i32
    %c0_i32_0 = arith.constant 0 : i32
    %c0_i32_1 = arith.constant 0 : i32
    return %c0_i32, %c0_i32_0 : i32, i32
  }
  func.func @transform_6(%arg0: i32) -> (i32, i32) {
    %c0_i32 = arith.constant 0 : i32
    %c0_i32_0 = arith.constant 0 : i32
    %c0_i32_1 = arith.constant 0 : i32
    return %c0_i32, %c0_i32_0 : i32, i32
  }
  func.func @transform_7(%arg0: i32) -> (i32, i32) {
    %c0_i32 = arith.constant 0 : i32
    %c0_i32_0 = arith.constant 0 : i32
    %c0_i32_1 = arith.constant 0 : i32
    return %c0_i32, %c0_i32_0 : i32, i32
  }
  func.func @transform_8(%arg0: i32) -> (i32, i32) {
    %c0_i32 = arith.constant 0 : i32
    %c0_i32_0 = arith.constant 0 : i32
    %c0_i32_1 = arith.constant 0 : i32
    return %c0_i32, %c0_i32_0 : i32, i32
  }
}

</mosaic_0001>

<bundles_post_ra>
// kernel: tpu_custom_call.1
= control target key start
LH: loop header
LB: loop body
LE: loop exit
PB: predicated region body
PF: predicated region fallthrough
CT: control target
= control target key end

     0   :  { %13 = vsyncpa [#allocation3], 0  ;;  %s2400_s0 = inlined_call_operand.hbm [shape: f32[2,8,32], index: 0, kind: input, shape index: {}]   ;;  %s2401_s1 = inlined_call_operand.vmem [shape: f32[2,8,8,32], index: 1, kind: input, shape index: {}]   ;;  %s2402_s2 = inlined_call_operand.vmem [shape: f32[128,1], index: 2, kind: input, shape index: {}]   ;;  %s2403_s3 = inlined_call_operand.hbm [shape: f32[32,384], index: 3, kind: input, shape index: {}]   ;;  %s2404_s4 = inlined_call_operand.vmem [shape: f32[32,32], index: 4, kind: input, shape index: {}]   ;;  %s2405_s5 = inlined_call_operand.vmem [shape: f32[1,32], index: 5, kind: input, shape index: {}]   ;;  %s2406_s6 = inlined_call_operand.vmem [shape: f32[32,4], index: 6, kind: input, shape index: {}]   ;;  %s2407_s7 = inlined_call_operand.vmem [shape: f32[4,32], index: 7, kind: input, shape index: {}]   ;;  %s2408_s8 = inlined_call_operand.hbm [shape: f32[2,32], index: 8, kind: output, shape index: {}]  }
   0x1   :  { %14 = vsyncpa [#allocation6], 0 }
   0x2   :  { %15 = vsyncpa [#allocation4], 0  ;;  %s1830_s27 = smov [#allocation2]  }
   0x3   :  { %s21_s28 = sshll.u32 %s1830_s27, 4  ;;  %s22_s28 = int_to_ptr.vmem [resolvable:$true] %s21_s28 }
   0x4   :  { %s1772_s29 = scalar_lea.vmem %s22_s28, 256  ;;  %p1777_p1 = scmp.lt.s32.totalorder %s22_s28, %s22_s28 }
   0x5   :  { %p1773_p0 = scmp.ne.s32.totalorder %s22_s28, %s1772_s29  ;;  %p1778_p2 = scmp.lt.s32.totalorder %s1772_s29, %s1772_s29 }
   0x7   :  { %p1779_p3 = por %p1778_p2, %p1777_p1 }
   0x9   :  { %p1780_p4 = pnand %p1779_p3, %p1773_p0 }
   0xb   :  { %1783 = shalt.err (!%p1780_p4)
}
   0xc   :  { %s1831_s30 = smov 128   ;;  %s1832_s9 = smov 8  }
   0xd   :  { %27 = dma.hbm_to_vmem [thread:$0]  %s2400_s0, 256, %s22_s28, [#allocation3], %s1831_s30, %s1831_s30, %s1832_s9  }
   0xe   :  { %s1833_s12 = smov [#allocation5]  }
   0xf   :  { %s37_s13 = sshll.u32 %s1833_s12, 4  ;;  %s38_s13 = int_to_ptr.vmem [resolvable:$true] %s37_s13 }
  0x10   :  { %s1792_s14 = scalar_lea.vmem %s38_s13, 1536  ;;  %p1797_p6 = scmp.lt.s32.totalorder %s38_s13, %s38_s13 }
  0x11   :  { %p1793_p5 = scmp.ne.s32.totalorder %s38_s13, %s1792_s14  ;;  %p1798_p7 = scmp.lt.s32.totalorder %s1792_s14, %s1792_s14 }
  0x13   :  { %p1799_p8 = por %p1798_p7, %p1797_p6 }
  0x15   :  { %p1800_p9 = pnand %p1799_p8, %p1793_p5 }
  0x17   :  { %1803 = shalt.err (!%p1800_p9)
}
  0x18   :  { %s1834_s15 = smov 384   ;;  %s1835_s16 = smov 24  }
  0x19   :  { %43 = dma.hbm_to_vmem [thread:$0]  %s2403_s3, 1536, %s38_s13, [#allocation6], %s1834_s15, %s1834_s15, %s1835_s16  }
  0x1a   :  { %1824 = dma.done.wait [#allocation3], 256  }
  0x1b   :  { %1825 = vsyncadd [#allocation3], 4294967040 }
  0x1c   :  { %1826 = dma.done.wait [#allocation6], 1536  }
  0x1d   :  { %1827 = vsyncadd [#allocation6], 4294965760  ;;  %v1836_v0 = vmov 0.0   ;;  %v213_v1 = vld [vmem:[#allocation5 + $0x50] sm:$0xff]  ;;  %v212_v2 = vld [vmem:[#allocation5 + $0x48] sm:$0xff]  ;;  %vm76_vm0 = vcmask 261120  }
  0x1e   :  { %285 = vmatprep.mubr.f32.mxu1 %v1836_v0  ;;  %v210_v3 = vld [vmem:[#allocation5 + $0x38] sm:$0xff]  ;;  %245 = vmatprep.subr.mxu1 %v213_v1  ;;  %v209_v4 = vld [vmem:[#allocation5 + $0x30] sm:$0xff]  ;;  %v207_v5 = vld [vmem:[#allocation5 + $0x20] sm:$0xff]  ;;  %v1837_v17 = vmov 0   ;;  %vm389_vm1 = vcmask 1041409   ;;  %vm391_vm2 = vcmask 1042434  }
  0x1f   :  { %246 = vmatpush1.msra.mxu1 %v212_v2  ;;  %v206_v6 = vld [vmem:[#allocation5 + $0x18] sm:$0xff]  ;;  %v204_v7 = vld [vmem:[#allocation5 + $0x8] sm:$0xff]  ;;  %v203_v8 = vld [vmem:[#allocation5] sm:$0xff]  ;;  %1698 = vset.pattern.permute.xlu0 %v1837_v17  ;;  %vm393_vm3 = vcmask 1043459   ;;  %vm395_vm4 = vcmask 1044484   ;;  %vm397_vm5 = vcmask 1045509  }
  0x20   :  { %247 = vmatprep.subr.mxu1 %v210_v3  ;;  %v58_v9 = vld [vmem:[#allocation2] sm:$0xff]  ;;  %v1892_v10 = vld [vmem:[#allocation2 + $0x8] sm:$0xff]  ;;  %v617_v11 = vld [vmem:[%s2406_s6 + $0x18] sm:$0xff]  ;;  %1699 = vset.pattern.permute.xlu1 %v1837_v17  ;;  %vm399_vm6 = vcmask 1046534   ;;  %vm401_vm7 = vcmask 1047559   ;;  %vm907_vm8 = vcmask 31744  }
  0x21   :  { %248 = vmatpush1.msra.mxu1 %v209_v4  ;;  %1640 = vmatprep.subr.mxu0 %v617_v11  ;;  %v616_v12 = vld [vmem:[%s2406_s6 + $0x10] sm:$0xff]  ;;  %v615_v13 = vld [vmem:[%s2406_s6 + $0x8] sm:$0xff]  ;;  %v614_v14 = vld [vmem:[%s2406_s6] sm:$0xff]  ;;  %vm1359_vm9 = vcmask 1043456   ;;  %vm1550_vm10 = vcmask 254976  }
  0x22   :  { %249 = vmatprep.subr.mxu1 %v207_v5  ;;  %1641 = vmatpush3.msra.mxu0 %v617_v11  ;;  %v618_v15 = vld [vmem:[%s2402_s2] sm:$0xff]  ;;  %v620_v16 = vld [vmem:[%s2402_s2 + $0x10] sm:$0xff]  ;;  %v619_v18 = vld [vmem:[%s2402_s2 + $0x8] sm:$0xff] }
  0x23   :  { %250 = vmatpush1.msra.mxu1 %v206_v6  ;;  %1642 = vmatprep.subr.mxu0 %v616_v12  ;;  %v626_v19 = vld [vmem:[%s2402_s2 + $0x40] sm:$0xff]  ;;  %v627_v20 = vld [vmem:[%s2402_s2 + $0x48] sm:$0xff]  ;;  %v621_v21 = vld [vmem:[%s2402_s2 + $0x18] sm:$0xff] }
  0x24   :  { %251 = vmatprep.subr.mxu1 %v204_v7  ;;  %1643 = vmatpush3.msra.mxu0 %v616_v12  ;;  %v628_v22 = vld [vmem:[%s2402_s2 + $0x50] sm:$0xff]  ;;  %v622_v23 = vld [vmem:[%s2402_s2 + $0x20] sm:$0xff]  ;;  %v629_v24 = vld [vmem:[%s2402_s2 + $0x58] sm:$0xff] }
  0x25   :  { %252 = vmatpush1.msra.mxu1 %v203_v8  ;;  %1644 = vmatprep.subr.mxu0 %v615_v13  ;;  %v623_v25 = vld [vmem:[%s2402_s2 + $0x28] sm:$0xff]  ;;  %v630_v26 = vld [vmem:[%s2402_s2 + $0x60] sm:$0xff]  ;;  %v624_v27 = vld [vmem:[%s2402_s2 + $0x30] sm:$0xff] }
  0x26   :  { %1568 = vmatmul.mubr.msk.f32.vlgmr.msra.gmra.mxu1 %vm76_vm0, %v58_v9  ;;  %1645 = vmatpush3.msra.mxu0 %v615_v13  ;;  %v631_v28 = vld [vmem:[%s2402_s2 + $0x68] sm:$0xff]  ;;  %v625_v29 = vld [vmem:[%s2402_s2 + $0x38] sm:$0xff]  ;;  %v632_v30 = vld [vmem:[%s2402_s2 + $0x70] sm:$0xff] }
  0x27   :  { %291 = vmatprep.mubr.f32.mxu1 %v1836_v0  ;;  %1646 = vmatprep.subr.mxu0 %v614_v14  ;;  %v633_v31 = vld [vmem:[%s2402_s2 + $0x78] sm:$0xff]  ;;  %v60_v32 = vld [vmem:[%s2401_s1] sm:$0xff]  ;;  %v61_v33 = vld [vmem:[%s2401_s1 + $0x8] sm:$0xff] }
  0x28   :  { %1647 = vmatpush3.msra.mxu0 %v614_v14  ;;  %636 = vperm.xlu0 %1698, %v618_v15   ;;  %v1964_v34 = vsel %vm76_vm0, %v60_v32, -inf  ;;  %v62_v35 = vld [vmem:[%s2401_s1 + $0x10] sm:$0xff]  ;;  %v1970_v36 = vsel %vm76_vm0, %v61_v33, -inf  ;;  %v68_v38 = vld [vmem:[%s2401_s1 + $0x40] sm:$0xff]  ;;  %v69_v39 = vld [vmem:[%s2401_s1 + $0x48] sm:$0xff] }
  0x29   :  { %646 = vperm.xlu1 %1699, %v620_v16   ;;  %v78_v37 = vrot.slane %v1964_v34, 4  ;;  %v63_v40 = vld [vmem:[%s2401_s1 + $0x18] sm:$0xff]  ;;  %v64_v41 = vld [vmem:[%s2401_s1 + $0x20] sm:$0xff]  ;;  %v85_v42 = vrot.slane %v1970_v36, 4  ;;  %v1987_v43 = vsel %vm76_vm0, %v62_v35, -inf  ;;  %v70_v44 = vld [vmem:[%s2401_s1 + $0x50] sm:$0xff] }
  0x2a   :  { %1569 = vmatmul.mubr.msk.f32.gmra.mxu1 %vm76_vm0, %v1892_v10  ;;  %v1993_v45 = vsel %vm76_vm0, %v68_v38, -inf  ;;  %v1996_v46 = vsel %vm76_vm0, %v69_v39, -inf  ;;  %v65_v47 = vld [vmem:[%s2401_s1 + $0x28] sm:$0xff]  ;;  %v92_v49 = vrot.slane %v1987_v43, 4  ;;  %v2004_v50 = vsel %vm76_vm0, %v63_v40, -inf  ;;  %v71_v53 = vld [vmem:[%s2401_s1 + $0x58] sm:$0xff] }
  0x2b   :  { %1637 = vmatprep.mubr.msk.f32.mxu1 %vm76_vm0, %v58_v9  ;;  %v79_v48 = vmax.f32 %v1964_v34, %v78_v37  ;;  %v2007_v51 = vsel %vm76_vm0, %v64_v41, -inf  ;;  %v86_v52 = vmax.f32 %v1970_v36, %v85_v42  ;;  %v134_v54 = vrot.slane %v1993_v45, 4  ;;  %v66_v60 = vld [vmem:[%s2401_s1 + $0x30] sm:$0xff]  ;;  %v72_v0 = vld [vmem:[%s2401_s1 + $0x60] sm:$0xff]  ;;  %v67_v6 = vld [vmem:[%s2401_s1 + $0x38] sm:$0xff] }
  0x2c   :  { %641 = vperm.xlu0 %1698, %v619_v18   ;;  %v141_v55 = vrot.slane %v1996_v46, 4  ;;  %v2016_v56 = vsel %vm76_vm0, %v70_v44, -inf  ;;  %v99_v57 = vrot.slane %v2004_v50, 4  ;;  %v106_v58 = vrot.slane %v2007_v51, 4  ;;  %v73_v13 = vld [vmem:[%s2401_s1 + $0x68] sm:$0xff]  ;;  %v75_v35 = vld [vmem:[%s2401_s1 + $0x78] sm:$0xff] }
  0x2d   :  { %676 = vperm.xlu1 %1699, %v626_v19   ;;  %v2021_v59 = vsel %vm76_vm0, %v65_v47, -inf  ;;  %v80_v61 = vrot.slane %v79_v48, 2  ;;  %v93_v62 = vmax.f32 %v1987_v43, %v92_v49  ;;  %v87_v63 = vrot.slane %v86_v52, 2 }
  0x2e   :  { %v148_v1 = vrot.slane %v2016_v56, 4  ;;  %v2032_v2 = vsel %vm76_vm0, %v71_v53, -inf  ;;  %v113_v3 = vrot.slane %v2021_v59, 4  ;;  %v135_v4 = vmax.f32 %v1993_v45, %v134_v54 }
  0x2f   :  { %v142_v5 = vmax.f32 %v1996_v46, %v141_v55  ;;  %v100_v7 = vmax.f32 %v2004_v50, %v99_v57  ;;  %v107_v8 = vmax.f32 %v2007_v51, %v106_v58  ;;  %v2043_v9 = vsel %vm76_vm0, %v66_v60, -inf }
  0x30   :  { %681 = vperm.xlu0 %1698, %v627_v20   ;;  %v81_v11 = vmax.f32 %v79_v48, %v80_v61  ;;  %v94_v12 = vrot.slane %v93_v62, 2  ;;  %v155_v14 = vrot.slane %v2032_v2, 4  ;;  %v2050_v15 = vsel %vm76_vm0, %v72_v0, -inf }
  0x31   :  { %651 = vperm.xlu1 %1699, %v621_v21   ;;  %v88_v16 = vmax.f32 %v86_v52, %v87_v63  ;;  %v149_v17 = vmax.f32 %v2016_v56, %v148_v1  ;;  %v114_v18 = vmax.f32 %v2021_v59, %v113_v3  ;;  %v2055_v19 = vsel %vm76_vm0, %v67_v6, -inf }
  0x32   :  { %v136_v20 = vrot.slane %v135_v4, 2  ;;  %v143_v21 = vrot.slane %v142_v5, 2  ;;  %v127_v32 = vrot.slane %v2055_v19, 4  ;;  %v2078_v58 = vsel %vm76_vm0, %v75_v35, -inf }
  0x33   :  { %v150_v33 = vrot.slane %v149_v17, 2  ;;  %v115_v42 = vrot.slane %v114_v18, 2 }
  0x34   :  { %686 = vperm.xlu0 %1698, %v628_v22   ;;  %v101_v22 = vrot.slane %v100_v7, 2  ;;  %v137_v37 = vmax.f32 %v135_v4, %v136_v20  ;;  %v144_v38 = vmax.f32 %v142_v5, %v143_v21  ;;  %v128_v1 = vmax.f32 %v2055_v19, %v127_v32 }
  0x35   :  { %656 = vperm.xlu1 %1699, %v622_v23   ;;  %v120_v23 = vrot.slane %v2043_v9, 4  ;;  %v151_v55 = vmax.f32 %v149_v17, %v150_v33  ;;  %v116_v5 = vmax.f32 %v114_v18, %v115_v42 }
  0x36   :  { %v102_v41 = vmax.f32 %v100_v7, %v101_v22  ;;  %v138_v60 = vrot.slane %v137_v37, 1  ;;  %v145_v61 = vrot.slane %v144_v38, 1  ;;  %v183_v7 = vrot.slane %v2078_v58, 4 }
  0x37   :  { %v121_v44 = vmax.f32 %v2043_v9, %v120_v23  ;;  %v129_v22 = vrot.slane %v128_v1, 2 }
  0x38   :  { %691 = vperm.xlu0 %1698, %v629_v24   ;;  %v74_v24 = vld [vmem:[%s2401_s1 + $0x70] sm:$0xff]  ;;  %v103_v63 = vrot.slane %v102_v41, 1 }
  0x39   :  { %661 = vperm.xlu1 %1699, %v623_v25   ;;  %v162_v25 = vrot.slane %v2050_v15, 4  ;;  %v2072_v40 = vsel %vm76_vm0, %v74_v24, -inf  ;;  %v122_v0 = vrot.slane %v121_v44, 2  ;;  %v130_v33 = vmax.f32 %v128_v1, %v129_v22 }
  0x3a   :  { %v176_v57 = vrot.slane %v2072_v40, 4  ;;  %v104_v20 = vmax.f32 %v102_v41, %v103_v63 }
  0x3b   :  { %v163_v47 = vmax.f32 %v2050_v15, %v162_v25  ;;  %v123_v21 = vmax.f32 %v121_v44, %v122_v0  ;;  %v184_v25 = vmax.f32 %v2078_v58, %v183_v7  ;;  %v424_v0 = vlaneseq }
  0x3c   :  { %696 = vperm.xlu0 %1698, %v630_v26   ;;  %v2063_v26 = vsel %vm76_vm0, %v73_v13, -inf  ;;  %v190_v7 = vmax.f32 %v1970_v36, %v2004_v50 }
  0x3d   :  { %666 = vperm.xlu1 %1699, %v624_v27   ;;  %v82_v27 = vrot.slane %v81_v11, 1  ;;  %v169_v39 = vrot.slane %v2063_v26, 4  ;;  %v164_v3 = vrot.slane %v163_v47, 2  ;;  %v185_v41 = vrot.slane %v184_v25, 2 }
  0x3f   :  { %v83_v48 = vmax.f32 %v81_v11, %v82_v27  ;;  %v152_v11 = vrot.slane %v151_v55, 1  ;;  %v165_v23 = vmax.f32 %v163_v47, %v164_v3  ;;  %v117_v27 = vrot.slane %v116_v5, 1 }
  0x40   :  { %701 = vperm.xlu0 %1698, %v631_v28   ;;  %v95_v28 = vmax.f32 %v93_v62, %v94_v12  ;;  %v170_v62 = vmax.f32 %v2063_v26, %v169_v39  ;;  %v177_v12 = vmax.f32 %v2072_v40, %v176_v57 }
  0x41   :  { %671 = vperm.xlu1 %1699, %v625_v29   ;;  %v108_v29 = vrot.slane %v107_v8, 2  ;;  %v118_v42 = vmax.f32 %v116_v5, %v117_v27 }
  0x42   :  { %v96_v49 = vrot.slane %v95_v28, 1  ;;  %v171_v17 = vrot.slane %v170_v62, 2 }
  0x43   :  { %v109_v52 = vmax.f32 %v107_v8, %v108_v29  ;;  %v178_v29 = vrot.slane %v177_v12, 2 }
  0x44   :  { %706 = vperm.xlu0 %1698, %v632_v30   ;;  %v156_v30 = vmax.f32 %v2032_v2, %v155_v14  ;;  %v97_v4 = vmax.f32 %v95_v28, %v96_v49  ;;  %v139_v14 = vmax.f32 %v137_v37, %v138_v60  ;;  %v153_v28 = vmax.f32 %v151_v55, %v152_v11 }
  0x45   :  { %711 = vperm.xlu1 %1699, %v633_v31   ;;  %v89_v31 = vrot.slane %v88_v16, 1  ;;  %v110_v13 = vrot.slane %v109_v52, 1  ;;  %v166_v37 = vrot.slane %v165_v23, 1  ;;  %v179_v44 = vmax.f32 %v177_v12, %v178_v29 }
  0x46   :  { %v157_v53 = vrot.slane %v156_v30, 2  ;;  %v186_v55 = vmax.f32 %v184_v25, %v185_v41 }
  0x47   :  { %v90_v54 = vmax.f32 %v88_v16, %v89_v31  ;;  %v146_v16 = vmax.f32 %v144_v38, %v145_v61  ;;  %v172_v31 = vmax.f32 %v170_v62, %v171_v17  ;;  %v124_v38 = vrot.slane %v123_v21, 1 }
  0x48   :  { %v158_v6 = vmax.f32 %v156_v30, %v157_v53  ;;  %v111_v30 = vmax.f32 %v109_v52, %v110_v13  ;;  %v131_v52 = vrot.slane %v130_v33, 1  ;;  %v167_v53 = vmax.f32 %v165_v23, %v166_v37 }
  0x49   :  { %v390_v8 = vsel %vm389_vm1, %v90_v54, %v83_v48  ;;  %v403_v32 = vsel %vm389_vm1, %v146_v16, %v139_v14  ;;  %v173_v49 = vrot.slane %v172_v31, 1  ;;  %v125_v54 = vmax.f32 %v123_v21, %v124_v38 }
  0x4a   :  { %v392_v24 = vsel %vm391_vm2, %v97_v4, %v390_v8  ;;  %v159_v18 = vrot.slane %v158_v6, 1  ;;  %v404_v47 = vsel %vm391_vm2, %v153_v28, %v403_v32  ;;  %v180_v61 = vrot.slane %v179_v44, 1 }
  0x4b   :  { %v394_v35 = vsel %vm393_vm3, %v104_v20, %v392_v24  ;;  %v1838_v62 = vmov 1966171168   ;;  %v174_v1 = vmax.f32 %v172_v31, %v173_v49  ;;  %v132_v3 = vmax.f32 %v130_v33, %v131_v52 }
  0x4c   :  { %v160_v39 = vmax.f32 %v158_v6, %v159_v18  ;;  %v396_v48 = vsel %vm395_vm4, %v111_v30, %v394_v35  ;;  %v422_v63 = vunpack.c.l.s4 %v1838_v62  ;;  %v189_v4 = vmax.f32 %v1964_v34, %v1987_v43 }
  0x4d   :  { %v398_v60 = vsel %vm397_vm5, %v118_v42, %v396_v48  ;;  %v187_v8 = vrot.slane %v186_v55, 1  ;;  %v181_v11 = vmax.f32 %v179_v44, %v180_v61  ;;  %v425_v13 = vshrl.u32 %v424_v0, 7 }
  0x4e   :  { %v405_v57 = vsel %vm393_vm3, %v160_v39, %v404_v47  ;;  %v400_v6 = vsel %vm399_vm6, %v125_v54, %v398_v60  ;;  %v423_v12 = vunpack.c.0.s8 %v422_v63  ;;  %v191_v17 = vmax.f32 %v189_v4, %v2007_v51 }
  0x4f   :  { %v406_v5 = vsel %vm395_vm4, %v167_v53, %v405_v57  ;;  %v402_v16 = vsel %vm401_vm7, %v132_v3, %v400_v6  ;;  %v192_v34 = vmax.f32 %v190_v7, %v2021_v59  ;;  %v188_v43 = vmax.f32 %v186_v55, %v187_v8 }
  0x50   :  { %v407_v14 = vsel %vm397_vm5, %v174_v1, %v406_v5  ;;  %v2104_v23 = vsub.s32 %v423_v12, %v425_v13  ;;  %v193_v24 = vmax.f32 %v191_v17, %v2043_v9  ;;  %v196_v59 = vmax.f32 %v1993_v45, %v2016_v56 }
  0x51   :  { %v408_v21 = vsel %vm399_vm6, %v181_v11, %v407_v14  ;;  %v194_v18 = vmax.f32 %v192_v34, %v2055_v19  ;;  %v2112_v29 = vsub.s32 0, %v425_v13  ;;  %v197_v31 = vmax.f32 %v1996_v46, %v2032_v2 }
  0x52   :  { %v409_v25 = vsel %vm401_vm7, %v188_v43, %v408_v21  ;;  %v198_v38 = vmax.f32 %v196_v59, %v2050_v15 }
  0x53   :  { %v195_v33 = vmax.f32 %v193_v24, %v194_v18  ;;  %v199_v56 = vmax.f32 %v197_v31, %v2063_v26 }
  0x54   :  { %v200_v53 = vmax.f32 %v198_v38, %v2072_v40 }
  0x55   :  { %v201_v57 = vmax.f32 %v199_v56, %v2078_v58  ;;  %v211_v56 = vld [vmem:[#allocation5 + $0x40] sm:$0xff] }
  0x57   :  { %v202_v3 = vmax.f32 %v200_v53, %v201_v57 }
  0xe6   :  { %v287_v20 = vpop.f32.mrf.mxu1 }
  0xe7   :  { %v412_v22 = vadd.f32 %v402_v16, %v287_v20 }
  0xe8   :  { %v289_v36 = vpop.f32.mrf.mxu1 }
  0xe9   :  { %v414_v50 = vmul.f32 0.17677669, %v412_v22  ;;  %v416_v44 = vadd.f32 %v289_v36, %v195_v33 }
  0xea   :  { %v293_v27 = vpop.f32.mrf.mxu1 }
  0xeb   :  { %v420_v28 = vcombine.high %v414_v50, %v414_v50  ;;  %v427_v51 = vrot.slane %v414_v50, %v2104_v23  ;;  %v413_v30 = vadd.f32 %v409_v25, %v293_v27 }
  0xec   :  { %v295_v6 = vpop.f32.mrf.mxu1 }
  0xed   :  { %v434_v32 = vrot.slane %v420_v28, %v2104_v23  ;;  %v435_v9 = vcombine.high %v427_v51, %v427_v51  ;;  %v443_v19 = vrot.slane %v427_v51, %v2104_v23  ;;  %v415_v41 = vmul.f32 0.17677669, %v413_v30 }
  0xee   :  { %v417_v14 = vadd.f32 %v295_v6, %v202_v3 }
  0xef   :  { %v457_v35 = vrot.slane %v435_v9, %v2104_v23  ;;  %v465_v37 = vcombine.high %v443_v19, %v443_v19  ;;  %v436_v39 = vcombine.high %v434_v32, %v434_v32  ;;  %v521_v45 = vrot.slane %v443_v19, %v2112_v29 }
  0xf0   :  { %v450_v42 = vrot.slane %v434_v32, %v2104_v23  ;;  %v476_v15 = vrot.slane %v415_v41, %v2104_v23  ;;  %v469_v61 = vcombine.high %v415_v41, %v415_v41 }
  0xf1   :  { %v467_v46 = vcombine.high %v457_v35, %v457_v35  ;;  %v525_v2 = vrot.slane %v457_v35, %v2112_v29  ;;  %v529_v47 = vrot.slane %v465_v37, %v2112_v29  ;;  %v598_v48 = vmul.f32 %v521_v45, %v416_v44  ;;  %v647_v35 = vpop.permute.xlu1 %646  ;;  %v214_v45 = vld [vmem:[#allocation5 + $0x58] sm:$0xff] }
  0xf2   :  { %v464_v52 = vrot.slane %v436_v39, %v2104_v23  ;;  %v466_v55 = vcombine.high %v450_v42, %v450_v42  ;;  %v537_v26 = vrot.slane %v450_v42, %v2112_v29  ;;  %v484_v63 = vcombine.high %v476_v15, %v476_v15  ;;  %v637_v39 = vpop.permute.xlu0 %636  ;;  %1629 = vmatprep.subr.mxu1 %v214_v45 }
  0xf3   :  { %v599_v49 = vmul.f32 %v525_v2, %v416_v44  ;;  %v600_v54 = vmul.f32 %v529_v47, %v416_v44  ;;  %1648 = vmatprep.mubr.msk.f32.mxu0 %vm76_vm0, %v598_v48  ;;  %v533_v60 = vrot.slane %v467_v46, %v2112_v29  ;;  %v492_v1 = vrot.slane %v476_v15, %v2104_v23  ;;  %v208_v2 = vld [vmem:[#allocation5 + $0x28] sm:$0xff]  ;;  %v205_v48 = vld [vmem:[#allocation5 + $0x10] sm:$0xff] }
  0xf4   :  { %v468_v62 = vcombine.high %v464_v52, %v464_v52  ;;  %v541_v40 = vrot.slane %v464_v52, %v2112_v29  ;;  %v602_v4 = vmul.f32 %v537_v26, %v416_v44  ;;  %v545_v5 = vrot.slane %v466_v55, %v2112_v29  ;;  %1630 = vmatpush3.msra.mxu1 %v214_v45 }
  0xf5   :  { %1649 = vmatmul.mubr.msk.f32.vlgmr.msra.gmra.mxu0 %vm76_vm0, %v599_v49  ;;  %v601_v0 = vmul.f32 %v533_v60, %v416_v44  ;;  %v483_v58 = vrot.slane %v469_v61, %v2104_v23  ;;  %v506_v7 = vrot.slane %v484_v63, %v2104_v23  ;;  %v514_v12 = vcombine.high %v492_v1, %v492_v1  ;;  %v2163_v37 = vpop.permute.xlu1 %676 }
  0xf6   :  { %1651 = vmatprep.mubr.msk.f32.mxu0 %vm76_vm0, %v600_v54  ;;  %v603_v8 = vmul.f32 %v541_v40, %v416_v44  ;;  %v549_v11 = vrot.slane %v468_v62, %v2112_v29  ;;  %v553_v13 = vrot.slane %v492_v1, %v2112_v29  ;;  %v604_v16 = vmul.f32 %v545_v5, %v416_v44  ;;  %v642_v42 = vpop.permute.xlu0 %641  ;;  %v1324_v54 = vld [vmem:[%s2407_s7] sm:$0xf] }
  0xf7   :  { %v485_v17 = vcombine.high %v483_v58, %v483_v58  ;;  %v516_v34 = vcombine.high %v506_v7, %v506_v7  ;;  %v557_v43 = vrot.slane %v506_v7, %v2112_v29  ;;  %v499_v21 = vrot.slane %v483_v58, %v2104_v23  ;;  %1631 = vmatprep.subr.mxu1 %v211_v56 }
  0xf8   :  { %v605_v20 = vmul.f32 %v549_v11, %v416_v44  ;;  %v561_v22 = vrot.slane %v514_v12, %v2112_v29  ;;  %v606_v36 = vmul.f32 %v553_v13, %v417_v14  ;;  %1632 = vmatpush3.msra.mxu1 %v211_v56 }
  0xf9   :  { %1652 = vmatmul.mubr.msk.f32.gmra.mxu0 %vm76_vm0, %v601_v0  ;;  %v513_v50 = vrot.slane %v485_v17, %v2104_v23  ;;  %v607_v24 = vmul.f32 %v557_v43, %v417_v14  ;;  %v565_v18 = vrot.slane %v516_v34, %v2112_v29  ;;  %v515_v25 = vcombine.high %v499_v21, %v499_v21  ;;  %v652_v38 = vpop.permute.xlu1 %651 }
  0xfa   :  { %1654 = vmatprep.mubr.msk.f32.mxu0 %vm76_vm0, %v602_v4  ;;  %v569_v27 = vrot.slane %v499_v21, %v2112_v29  ;;  %v608_v28 = vmul.f32 %v561_v22, %v417_v14  ;;  %1633 = vmatprep.subr.mxu1 %v208_v2  ;;  %v2180_v63 = vpop.permute.xlu0 %681 }
  0xfb   :  { %v517_v51 = vcombine.high %v513_v50, %v513_v50  ;;  %v609_v59 = vmul.f32 %v565_v18, %v417_v14  ;;  %v573_v30 = vrot.slane %v513_v50, %v2112_v29  ;;  %v577_v32 = vrot.slane %v515_v25, %v2112_v29  ;;  %1634 = vmatpush3.msra.mxu1 %v208_v2 }
  0xfc   :  { %v610_v31 = vmul.f32 %v569_v27, %v417_v14  ;;  %1635 = vmatprep.subr.mxu1 %v205_v48 }
  0xfd   :  { %1655 = vmatmul.mubr.msk.f32.gmra.mxu0 %vm76_vm0, %v603_v8  ;;  %v611_v23 = vmul.f32 %v573_v30, %v417_v14  ;;  %v581_v9 = vrot.slane %v517_v51, %v2112_v29  ;;  %v612_v19 = vmul.f32 %v577_v32, %v417_v14  ;;  %v657_v41 = vpop.permute.xlu1 %656  ;;  %1636 = vmatpush3.msra.mxu1 %v205_v48 }
  0xfe   :  { %1657 = vmatprep.mubr.msk.f32.mxu0 %vm76_vm0, %v604_v16  ;;  %1638 = vmatmul.mubr.msk.f32.vlgmr.msra.gmra.mxu1 %vm76_vm0, %v1892_v10  ;;  %v2194_v22 = vpop.permute.xlu0 %686 }
  0xff   :  { %v613_v33 = vmul.f32 %v581_v9, %v417_v14  ;;  %1672 = vmatprep.subr.msk.mxu1 %vm1359_vm9, %v1324_v54 }
 0x100   :  { %1673 = vmatpush3.msk.msra.mxu1 %vm1359_vm9, %v1324_v54 }
 0x101   :  { %1658 = vmatmul.mubr.msk.f32.gmra.mxu0 %vm76_vm0, %v605_v20  ;;  %v662_v29 = vpop.permute.xlu1 %661 }
 0x102   :  { %1660 = vmatprep.mubr.msk.f32.mxu0 %vm76_vm0, %v606_v36 }
 0x105   :  { %1661 = vmatmul.mubr.msk.f32.gmra.mxu0 %vm76_vm0, %v607_v24  ;;  %v667_v57 = vpop.permute.xlu1 %666 }
 0x106   :  { %1663 = vmatprep.mubr.msk.f32.mxu0 %vm76_vm0, %v608_v28 }
 0x109   :  { %1664 = vmatmul.mubr.msk.f32.gmra.mxu0 %vm76_vm0, %v609_v59  ;;  %v672_v16 = vpop.permute.xlu1 %671 }
 0x10a   :  { %1666 = vmatprep.mubr.msk.f32.mxu0 %vm76_vm0, %v610_v31 }
 0x10d   :  { %1667 = vmatmul.mubr.msk.f32.gmra.mxu0 %vm76_vm0, %v611_v23 }
 0x10e   :  { %1669 = vmatprep.mubr.msk.f32.mxu0 %vm76_vm0, %v612_v19 }
 0x111   :  { %1670 = vmatmul.mubr.msk.f32.gmra.mxu0 %vm76_vm0, %v613_v33 }
 0x1b5   :  { %v1650_v46 = vpop.f32.mrf.mxu0 }
 0x1b6   :  { %v2165_v44 = vadd.f32 %v1650_v46, %v642_v42 }
 0x1b7   :  { %v828_v47 = vpop.f32.mrf.mxu0 }
 0x1b8   :  { %v915_v49 = vsel %vm907_vm8, %v2165_v44, -inf  ;;  %v2169_v52 = vadd.f32 %v828_v47, %v637_v39  ;;  %v692_v47 = vpop.permute.xlu0 %691 }
 0x1b9   :  { %v916_v15 = vrot.slane %v915_v49, 4  ;;  %v1653_v53 = vpop.f32.mrf.mxu0 }
 0x1ba   :  { %v908_v55 = vsel %vm907_vm8, %v2169_v52, -inf  ;;  %v2176_v26 = vadd.f32 %v1653_v53, %v652_v38 }
 0x1bb   :  { %v917_v60 = vmax.f32 %v915_v49, %v916_v15  ;;  %v909_v61 = vrot.slane %v908_v55, 4  ;;  %v838_v62 = vpop.f32.mrf.mxu0 }
 0x1bc   :  { %v929_v0 = vsel %vm907_vm8, %v2176_v26, -inf  ;;  %v2184_v40 = vadd.f32 %v838_v62, %v647_v35 }
 0x1bd   :  { %v918_v1 = vrot.slane %v917_v60, 2  ;;  %v910_v3 = vmax.f32 %v908_v55, %v909_v61  ;;  %v930_v4 = vrot.slane %v929_v0, 4  ;;  %v1656_v5 = vpop.f32.mrf.mxu0 }
 0x1be   :  { %v922_v10 = vsel %vm907_vm8, %v2184_v40, -inf  ;;  %v2188_v6 = vadd.f32 %v1656_v5, %v662_v29 }
 0x1bf   :  { %v919_v58 = vmax.f32 %v917_v60, %v918_v1  ;;  %v911_v7 = vrot.slane %v910_v3, 2  ;;  %v931_v8 = vmax.f32 %v929_v0, %v930_v4  ;;  %v923_v11 = vrot.slane %v922_v10, 4  ;;  %v848_v12 = vpop.f32.mrf.mxu0 }
 0x1c0   :  { %v943_v13 = vsel %vm907_vm8, %v2188_v6, -inf  ;;  %v2192_v14 = vadd.f32 %v848_v12, %v657_v41  ;;  %v697_v12 = vpop.permute.xlu0 %696 }
 0x1c1   :  { %v920_v17 = vrot.slane %v919_v58, 1  ;;  %v912_v34 = vmax.f32 %v910_v3, %v911_v7  ;;  %v932_v43 = vrot.slane %v931_v8, 2  ;;  %v924_v20 = vmax.f32 %v922_v10, %v923_v11  ;;  %v1659_v21 = vpop.f32.mrf.mxu0 }
 0x1c2   :  { %v944_v36 = vrot.slane %v943_v13, 4  ;;  %v936_v50 = vsel %vm907_vm8, %v2192_v14, -inf  ;;  %v2198_v24 = vadd.f32 %v1659_v21, %v672_v16 }
 0x1c3   :  { %v921_v18 = vmax.f32 %v919_v58, %v920_v17  ;;  %v913_v25 = vrot.slane %v912_v34, 1  ;;  %v933_v27 = vmax.f32 %v931_v8, %v932_v43  ;;  %v925_v28 = vrot.slane %v924_v20, 2  ;;  %v858_v51 = vpop.f32.mrf.mxu0 }
 0x1c4   :  { %v945_v59 = vmax.f32 %v943_v13, %v944_v36  ;;  %v937_v30 = vrot.slane %v936_v50, 4  ;;  %v957_v31 = vsel %vm907_vm8, %v2198_v24, -inf  ;;  %v2202_v32 = vadd.f32 %v858_v51, %v667_v57 }
 0x1c5   :  { %v1021_v23 = vsub.f32 %v2165_v44, %v921_v18  ;;  %v914_v9 = vmax.f32 %v912_v34, %v913_v25  ;;  %v934_v19 = vrot.slane %v933_v27, 1  ;;  %v926_v33 = vmax.f32 %v924_v20, %v925_v28  ;;  %v1662_v35 = vpop.f32.mrf.mxu0 }
 0x1c6   :  { %v946_v38 = vrot.slane %v945_v59, 2  ;;  %v938_v39 = vmax.f32 %v936_v50, %v937_v30  ;;  %v958_v41 = vrot.slane %v957_v31, 4  ;;  %v950_v45 = vsel %vm907_vm8, %v2202_v32, -inf }
 0x1c7   :  { %v1038_v56 = vmul.f32 1.442695, %v1021_v23  ;;  %v1020_v42 = vsub.f32 %v2169_v52, %v914_v9  ;;  %v935_v29 = vmax.f32 %v933_v27, %v934_v19  ;;  %v927_v46 = vrot.slane %v926_v33, 1  ;;  %v868_v2 = vpop.f32.mrf.mxu0  ;;  %v702_v19 = vpop.permute.xlu0 %701 }
 0x1c8   :  { %v947_v48 = vmax.f32 %v945_v59, %v946_v38  ;;  %v939_v49 = vrot.slane %v938_v39, 2  ;;  %v959_v44 = vmax.f32 %v957_v31, %v958_v41  ;;  %v951_v15 = vrot.slane %v950_v45, 4 }
 0x1c9   :  { %1700 = vpow2.f32 %v1038_v56  ;;  %v1036_v53 = vmul.f32 1.442695, %v1020_v42  ;;  %v1023_v54 = vsub.f32 %v2176_v26, %v935_v29  ;;  %v928_v55 = vmax.f32 %v926_v33, %v927_v46  ;;  %v1665_v57 = vpop.f32.mrf.mxu0 }
 0x1ca   :  { %v948_v60 = vrot.slane %v947_v48, 1  ;;  %v940_v61 = vmax.f32 %v938_v39, %v939_v49  ;;  %v960_v62 = vrot.slane %v959_v44, 2  ;;  %v952_v0 = vmax.f32 %v950_v45, %v951_v15 }
 0x1cb   :  { %1702 = vpow2.f32 %v1036_v53  ;;  %v1042_v52 = vmul.f32 1.442695, %v1023_v54  ;;  %v1022_v1 = vsub.f32 %v2184_v40, %v928_v55  ;;  %v2211_v3 = vadd.f32 %v1662_v35, %v2180_v63  ;;  %v878_v4 = vpop.f32.mrf.mxu0 }
 0x1cc   :  { %v949_v5 = vmax.f32 %v947_v48, %v948_v60  ;;  %v941_v10 = vrot.slane %v940_v61, 1  ;;  %v961_v58 = vmax.f32 %v959_v44, %v960_v62  ;;  %v953_v7 = vrot.slane %v952_v0, 2 }
 0x1cd   :  { %1704 = vpow2.f32 %v1042_v52  ;;  %v1040_v26 = vmul.f32 1.442695, %v1022_v1  ;;  %v971_v8 = vsel %vm907_vm8, %v2211_v3, -inf  ;;  %v2216_v11 = vadd.f32 %v868_v2, %v2163_v37  ;;  %v1668_v20 = vpop.f32.mrf.mxu0 }
 0x1ce   :  { %v1025_v13 = vsub.f32 %v2188_v6, %v949_v5  ;;  %v942_v40 = vmax.f32 %v940_v61, %v941_v10  ;;  %v962_v16 = vrot.slane %v961_v58, 1  ;;  %v954_v63 = vmax.f32 %v952_v0, %v953_v7 }
 0x1cf   :  { %1706 = vpow2.f32 %v1040_v26  ;;  %v972_v17 = vrot.slane %v971_v8, 4  ;;  %v964_v34 = vsel %vm907_vm8, %v2216_v11, -inf  ;;  %v2221_v43 = vadd.f32 %v1665_v57, %v692_v47  ;;  %v888_v9 = vpop.f32.mrf.mxu0 }
 0x1d0   :  { %v1046_v21 = vmul.f32 1.442695, %v1025_v13  ;;  %v1024_v36 = vsub.f32 %v2192_v14, %v942_v40  ;;  %v963_v50 = vmax.f32 %v961_v58, %v962_v16  ;;  %v955_v37 = vrot.slane %v954_v63, 1 }
 0x1d1   :  { %v973_v18 = vmax.f32 %v971_v8, %v972_v17  ;;  %v965_v25 = vrot.slane %v964_v34, 4  ;;  %v985_v6 = vsel %vm907_vm8, %v2221_v43, -inf  ;;  %v2227_v27 = vadd.f32 %v878_v4, %v2194_v22 }
 0x1d2   :  { %1708 = vpow2.f32 %v1046_v21  ;;  %v1044_v28 = vmul.f32 1.442695, %v1024_v36  ;;  %v1027_v51 = vsub.f32 %v2198_v24, %v963_v50  ;;  %v956_v59 = vmax.f32 %v954_v63, %v955_v37 }
 0x1d3   :  { %v974_v30 = vrot.slane %v973_v18, 2  ;;  %v966_v31 = vmax.f32 %v964_v34, %v965_v25  ;;  %v986_v23 = vrot.slane %v985_v6, 4  ;;  %v978_v14 = vsel %vm907_vm8, %v2227_v27, -inf }
 0x1d4   :  { %1710 = vpow2.f32 %v1044_v28  ;;  %v1050_v33 = vmul.f32 1.442695, %v1027_v51  ;;  %v1026_v35 = vsub.f32 %v2202_v32, %v956_v59  ;;  %v979_v38 = vrot.slane %v978_v14, 4 }
 0x1d5   :  { %v975_v22 = vmax.f32 %v973_v18, %v974_v30  ;;  %v967_v39 = vrot.slane %v966_v31, 2  ;;  %v987_v41 = vmax.f32 %v985_v6, %v986_v23  ;;  %v2233_v45 = vadd.f32 %v1668_v20, %v702_v19 }
 0x1d6   :  { %v2235_v24 = vpop.eup %1700  ;;  %1712 = vpow2.f32 %v1050_v33  ;;  %v1048_v56 = vmul.f32 1.442695, %v1026_v35  ;;  %v980_v42 = vmax.f32 %v978_v14, %v979_v38  ;;  %v2237_v29 = vadd.f32 %v888_v9, %v697_v12 }
 0x1d7   :  { %v1075_v46 = vsel %vm907_vm8, %v2235_v24, 0.0  ;;  %v976_v2 = vrot.slane %v975_v22, 1  ;;  %v968_v47 = vmax.f32 %v966_v31, %v967_v39  ;;  %v988_v48 = vrot.slane %v987_v41, 2 }
 0x1d8   :  { %v2241_v32 = vpop.eup %1702  ;;  %v1076_v49 = vrot.slane %v1075_v46, 4  ;;  %1714 = vpow2.f32 %v1048_v56  ;;  %v981_v44 = vrot.slane %v980_v42, 2  ;;  %v2245_v15 = vsel %vm907_vm8, %v2233_v45, -inf }
 0x1d9   :  { %v1068_v53 = vsel %vm907_vm8, %v2241_v32, 0.0  ;;  %v977_v54 = vmax.f32 %v975_v22, %v976_v2  ;;  %v969_v55 = vrot.slane %v968_v47, 1  ;;  %v989_v57 = vmax.f32 %v987_v41, %v988_v48 }
 0x1da   :  { %v2249_v60 = vpop.eup %1704  ;;  %v1077_v61 = vadd.f32 %v1076_v49, %v1075_v46  ;;  %v1069_v62 = vrot.slane %v1068_v53, 4  ;;  %v982_v0 = vmax.f32 %v980_v42, %v981_v44  ;;  %v1000_v52 = vrot.slane %v2245_v15, 4 }
 0x1db   :  { %v1089_v1 = vsel %vm907_vm8, %v2249_v60, 0.0  ;;  %v1029_v4 = vsub.f32 %v2211_v3, %v977_v54  ;;  %v970_v5 = vmax.f32 %v968_v47, %v969_v55  ;;  %v990_v10 = vrot.slane %v989_v57, 1 }
 0x1dc   :  { %v2255_v58 = vpop.eup %1706  ;;  %v1078_v7 = vrot.slane %v1077_v61, 2  ;;  %v1070_v26 = vadd.f32 %v1069_v62, %v1068_v53  ;;  %v1090_v8 = vrot.slane %v1089_v1, 4  ;;  %v983_v12 = vrot.slane %v982_v0, 1 }
 0x1dd   :  { %v1082_v13 = vsel %vm907_vm8, %v2255_v58, 0.0  ;;  %v1054_v40 = vmul.f32 1.442695, %v1029_v4  ;;  %v1028_v16 = vsub.f32 %v2216_v11, %v970_v5  ;;  %v991_v63 = vmax.f32 %v989_v57, %v990_v10 }
 0x1de   :  { %v1079_v17 = vadd.f32 %v1078_v7, %v1077_v61  ;;  %v1071_v34 = vrot.slane %v1070_v26, 2  ;;  %v1091_v20 = vadd.f32 %v1090_v8, %v1089_v1  ;;  %v1083_v21 = vrot.slane %v1082_v13, 4 }
 0x1df   :  { %v2260_v3 = vpop.eup %1708  ;;  %1716 = vpow2.f32 %v1054_v40  ;;  %v1052_v36 = vmul.f32 1.442695, %v1028_v16  ;;  %v1031_v50 = vsub.f32 %v2221_v43, %v991_v63  ;;  %v984_v37 = vmax.f32 %v982_v0, %v983_v12 }
 0x1e0   :  { %v1080_v18 = vrot.slane %v1079_v17, 1  ;;  %v1072_v25 = vadd.f32 %v1071_v34, %v1070_v26  ;;  %v1092_v6 = vrot.slane %v1091_v20, 2  ;;  %v1084_v28 = vadd.f32 %v1083_v21, %v1082_v13 }
 0x1e1   :  { %v2263_v51 = vpop.eup %1710  ;;  %v1103_v11 = vsel %vm907_vm8, %v2260_v3, 0.0  ;;  %1718 = vpow2.f32 %v1052_v36  ;;  %v1058_v59 = vmul.f32 1.442695, %v1031_v50  ;;  %v1030_v30 = vsub.f32 %v2227_v27, %v984_v37 }
 0x1e2   :  { %v1081_v31 = vadd.f32 %v1080_v18, %v1079_v17  ;;  %v1073_v23 = vrot.slane %v1072_v25, 1  ;;  %v1093_v14 = vadd.f32 %v1092_v6, %v1091_v20  ;;  %v1085_v9 = vrot.slane %v1084_v28, 2 }
 0x1e3   :  { %v2268_v19 = vpop.eup %1712  ;;  %v1104_v43 = vrot.slane %v1103_v11, 4  ;;  %v1096_v33 = vsel %vm907_vm8, %v2263_v51, 0.0  ;;  %1720 = vpow2.f32 %v1058_v59  ;;  %v1056_v35 = vmul.f32 1.442695, %v1030_v30 }
 0x1e4   :  { %1722 = vrcp.f32 %v1081_v31  ;;  %v1074_v38 = vadd.f32 %v1073_v23, %v1072_v25  ;;  %v1094_v22 = vrot.slane %v1093_v14, 1  ;;  %v1086_v39 = vadd.f32 %v1085_v9, %v1084_v28 }
 0x1e5   :  { %v2272_v41 = vpop.eup %1714  ;;  %v1105_v56 = vadd.f32 %v1104_v43, %v1103_v11  ;;  %v1097_v27 = vrot.slane %v1096_v33, 4  ;;  %v1117_v42 = vsel %vm907_vm8, %v2268_v19, 0.0  ;;  %1724 = vpow2.f32 %v1056_v35 }
 0x1e6   :  { %1726 = vrcp.f32 %v1074_v38  ;;  %v1095_v46 = vadd.f32 %v1094_v22, %v1093_v14  ;;  %v1087_v2 = vrot.slane %v1086_v39, 1  ;;  %v1118_v47 = vrot.slane %v1117_v42, 4 }
 0x1e7   :  { %v1106_v48 = vrot.slane %v1105_v56, 2  ;;  %v1098_v49 = vadd.f32 %v1097_v27, %v1096_v33  ;;  %v1110_v44 = vsel %vm907_vm8, %v2272_v41, 0.0  ;;  %v1001_v53 = vmax.f32 %v2245_v15, %v1000_v52  ;;  %v1671_v33 = vpop.f32.mrf.mxu0 }
 0x1e8   :  { %1728 = vrcp.f32 %v1095_v46  ;;  %v1088_v54 = vadd.f32 %v1087_v2, %v1086_v39  ;;  %v1119_v55 = vadd.f32 %v1118_v47, %v1117_v42  ;;  %v1111_v57 = vrot.slane %v1110_v44, 4  ;;  %v712_v46 = vpop.permute.xlu1 %711 }
 0x1e9   :  { %v1107_v61 = vadd.f32 %v1106_v48, %v1105_v56  ;;  %v1099_v62 = vrot.slane %v1098_v49, 2  ;;  %v1002_v0 = vrot.slane %v1001_v53, 2  ;;  %v992_v1 = vsel %vm907_vm8, %v2237_v29, -inf }
 0x1ea   :  { %1730 = vrcp.f32 %v1088_v54  ;;  %v1112_v4 = vadd.f32 %v1111_v57, %v1110_v44  ;;  %v1120_v8 = vrot.slane %v1119_v55, 2  ;;  %v993_v15 = vrot.slane %v992_v1, 4 }
 0x1eb   :  { %v1108_v5 = vrot.slane %v1107_v61, 1  ;;  %v1100_v10 = vadd.f32 %v1099_v62, %v1098_v49  ;;  %v1003_v7 = vmax.f32 %v1001_v53, %v1002_v0  ;;  %v898_v49 = vpop.f32.mrf.mxu0  ;;  %v2303_v54 = vadd.f32 %v1671_v33, %v712_v46 }
 0x1ec   :  { %v2281_v26 = vpop.eup %1716  ;;  %v1113_v12 = vrot.slane %v1112_v4, 2  ;;  %v1121_v50 = vadd.f32 %v1120_v8, %v1119_v55  ;;  %v994_v25 = vmax.f32 %v992_v1, %v993_v15  ;;  %v707_v55 = vpop.permute.xlu0 %706 }
 0x1ed   :  { %v1101_v52 = vrot.slane %v1100_v10, 1  ;;  %v1131_v13 = vsel %vm907_vm8, %v2281_v26, 0.0  ;;  %v1004_v40 = vrot.slane %v1003_v7, 1  ;;  %v1109_v63 = vadd.f32 %v1108_v5, %v1107_v61 }
 0x1ee   :  { %v2285_v16 = vpop.eup %1718  ;;  %v1114_v17 = vadd.f32 %v1113_v12, %v1112_v4  ;;  %v1132_v34 = vrot.slane %v1131_v13, 4  ;;  %v1122_v9 = vrot.slane %v1121_v50, 1  ;;  %v995_v43 = vrot.slane %v994_v25, 2 }
 0x1ef   :  { %v1102_v20 = vadd.f32 %v1101_v52, %v1100_v10  ;;  %v1005_v21 = vmax.f32 %v1003_v7, %v1004_v40  ;;  %v1124_v18 = vsel %vm907_vm8, %v2285_v16, 0.0  ;;  %v2307_v1 = vadd.f32 %v898_v49, %v707_v55 }
 0x1f0   :  { %v2287_v36 = vpop.eup %1720  ;;  %v1115_v37 = vrot.slane %v1114_v17, 1  ;;  %v1133_v59 = vadd.f32 %v1132_v34, %v1131_v13  ;;  %v1125_v23 = vrot.slane %v1124_v18, 4  ;;  %v1123_v47 = vadd.f32 %v1122_v9, %v1121_v50 }
 0x1f1   :  { %v1723_v6 = vpop.eup %1722  ;;  %1732 = vrcp.f32 %v1102_v20  ;;  %v1033_v28 = vsub.f32 %v2233_v45, %v1005_v21  ;;  %v1145_v42 = vsel %vm907_vm8, %v2287_v36, 0.0  ;;  %v996_v48 = vmax.f32 %v994_v25, %v995_v43 }
 0x1f2   :  { %v2292_v11 = vpop.eup %1724  ;;  %1734 = vrcp.f32 %v1109_v63  ;;  %v1116_v31 = vadd.f32 %v1115_v37, %v1114_v17  ;;  %v1134_v22 = vrot.slane %v1133_v59, 2  ;;  %v1183_v56 = vmul.f32 %v1723_v6, %v2235_v24 }
 0x1f3   :  { %v1727_v30 = vpop.eup %1726  ;;  %v1062_v14 = vmul.f32 1.442695, %v1033_v28  ;;  %v1138_v39 = vsel %vm907_vm8, %v2292_v11, 0.0  ;;  %v1126_v27 = vadd.f32 %v1125_v23, %v1124_v18  ;;  %v1146_v61 = vrot.slane %v1145_v42, 4 }
 0x1f4   :  { %v1181_v38 = vmul.f32 %v1727_v30, %v2241_v32  ;;  %v1139_v53 = vrot.slane %v1138_v39, 4  ;;  %v1135_v57 = vadd.f32 %v1134_v22, %v1133_v59  ;;  %v1219_v62 = vsel %vm907_vm8, %v1183_v56, 0.0 }
 0x1f5   :  { %v1729_v35 = vpop.eup %1728  ;;  %1736 = vpow2.f32 %v1062_v14  ;;  %v1127_v0 = vrot.slane %v1126_v27, 2  ;;  %v997_v4 = vrot.slane %v996_v48, 1  ;;  %v1013_v8 = vsel %vm907_vm8, %v2303_v54, -inf }
 0x1f6   :  { %1738 = vrcp.f32 %v1116_v31  ;;  %v1212_v32 = vsel %vm907_vm8, %v1181_v38, 0.0  ;;  %v1187_v44 = vmul.f32 %v1729_v35, %v2249_v60  ;;  %v2312_v60 = vld [vmem:[%s2404_s4 + $0x18] sm:$0xff]  ;;  %v1140_v7 = vadd.f32 %v1139_v53, %v1138_v39 }
 0x1f7   :  { %v1731_v45 = vpop.eup %1730  ;;  %1740 = vrcp.f32 %v1123_v47  ;;  %1677 = vmatprep.subr.mxu1 %v2312_v60  ;;  %v1220_v15 = vrot.slane %v1219_v62, 4  ;;  %v1136_v52 = vrot.slane %v1135_v57, 1  ;;  %v1147_v13 = vadd.f32 %v1146_v61, %v1145_v42 }
 0x1f8   :  { %v1185_v2 = vmul.f32 %v1731_v45, %v2255_v58  ;;  %v1213_v58 = vrot.slane %v1212_v32, 4  ;;  %v1233_v5 = vsel %vm907_vm8, %v1187_v44, 0.0  ;;  %v998_v40 = vmax.f32 %v996_v48, %v997_v4 }
 0x1f9   :  { %v1128_v34 = vadd.f32 %v1127_v0, %v1126_v27  ;;  %v1014_v20 = vrot.slane %v1013_v8, 4  ;;  %v1006_v21 = vsel %vm907_vm8, %v2307_v1, -inf  ;;  %v1234_v37 = vrot.slane %v1233_v5, 4 }
 0x1fa   :  { %v1226_v24 = vsel %vm907_vm8, %v1185_v2, 0.0  ;;  %v1214_v50 = vadd.f32 %v1213_v58, %v1212_v32  ;;  %v1032_v18 = vsub.f32 %v2237_v29, %v998_v40  ;;  %v1007_v25 = vrot.slane %v1006_v21, 4 }
 0x1fb   :  { %v1227_v10 = vrot.slane %v1226_v24, 4  ;;  %v1141_v59 = vrot.slane %v1140_v7, 2  ;;  %v1015_v30 = vmax.f32 %v1013_v8, %v1014_v20  ;;  %v1221_v43 = vadd.f32 %v1220_v15, %v1219_v62 }
 0x1fc   :  { %v1060_v14 = vmul.f32 1.442695, %v1032_v18  ;;  %v1129_v33 = vrot.slane %v1128_v34, 1  ;;  %v1148_v35 = vrot.slane %v1147_v13, 2  ;;  %v1215_v39 = vrot.slane %v1214_v50, 2 }
 0x1fd   :  { %v1228_v6 = vadd.f32 %v1227_v10, %v1226_v24  ;;  %v1016_v38 = vrot.slane %v1015_v30, 2  ;;  %v1235_v56 = vadd.f32 %v1234_v37, %v1233_v5  ;;  %v1142_v27 = vadd.f32 %v1141_v59, %v1140_v7 }
 0x1fe   :  { %v1733_v12 = vpop.eup %1732  ;;  %1742 = vpow2.f32 %v1060_v14  ;;  %v1222_v55 = vrot.slane %v1221_v43, 2  ;;  %v1137_v24 = vadd.f32 %v1136_v52, %v1135_v57  ;;  %v1149_v61 = vadd.f32 %v1148_v35, %v1147_v13 }
 0x1ff   :  { %v1735_v63 = vpop.eup %1734  ;;  %v1189_v17 = vmul.f32 %v1733_v12, %v2263_v51  ;;  %v1008_v51 = vmax.f32 %v1006_v21, %v1007_v25  ;;  %v1229_v46 = vrot.slane %v1228_v6, 2  ;;  %v1130_v58 = vadd.f32 %v1129_v33, %v1128_v34 }
 0x200   :  { %v1191_v31 = vmul.f32 %v1735_v63, %v2260_v3  ;;  %v1017_v3 = vmax.f32 %v1015_v30, %v1016_v38  ;;  %v1143_v4 = vrot.slane %v1142_v27, 1  ;;  %v1216_v7 = vadd.f32 %v1215_v39, %v1214_v50 }
 0x201   :  { %v1240_v28 = vsel %vm907_vm8, %v1189_v17, 0.0  ;;  %v1009_v45 = vrot.slane %v1008_v51, 2  ;;  %v1230_v15 = vadd.f32 %v1229_v46, %v1228_v6  ;;  %v1236_v63 = vrot.slane %v1235_v56, 2 }
 0x202   :  { %v1241_v23 = vrot.slane %v1240_v28, 4  ;;  %v2324_v9 = vpop.eup %1736  ;;  %v1247_v48 = vsel %vm907_vm8, %v1191_v31, 0.0  ;;  %v1018_v32 = vrot.slane %v1017_v3, 1  ;;  %v1223_v20 = vadd.f32 %v1222_v55, %v1221_v43 }
 0x203   :  { %v1739_v22 = vpop.eup %1738  ;;  %v1159_v29 = vsel %vm907_vm8, %v2324_v9, 0.0  ;;  %v1010_v2 = vmax.f32 %v1008_v51, %v1009_v45  ;;  %v1248_v53 = vrot.slane %v1247_v48, 4  ;;  %1744 = vrcp.f32 %v1137_v24 }
 0x204   :  { %v1160_v42 = vrot.slane %v1159_v29, 4  ;;  %v1242_v47 = vadd.f32 %v1241_v23, %v1240_v28  ;;  %v1193_v44 = vmul.f32 %v1739_v22, %v2272_v41  ;;  %v1741_v0 = vpop.eup %1740  ;;  %v1019_v5 = vmax.f32 %v1017_v3, %v1018_v32 }
 0x205   :  { %v1011_v62 = vrot.slane %v1010_v2, 1  ;;  %v1249_v17 = vadd.f32 %v1248_v53, %v1247_v48  ;;  %v1150_v57 = vrot.slane %v1149_v61, 1  ;;  %1746 = vrcp.f32 %v1130_v58 }
 0x206   :  { %v1161_v49 = vadd.f32 %v1160_v42, %v1159_v29  ;;  %v1243_v10 = vrot.slane %v1242_v47, 2  ;;  %v1035_v40 = vsub.f32 %v2303_v54, %v1019_v5  ;;  %v1254_v41 = vsel %vm907_vm8, %v1193_v44, 0.0 }
 0x207   :  { %v1012_v12 = vmax.f32 %v1010_v2, %v1011_v62  ;;  %v1144_v13 = vadd.f32 %v1143_v4, %v1142_v27  ;;  %v1217_v18 = vrot.slane %v1216_v7, 1  ;;  %v1255_v25 = vrot.slane %v1254_v41, 4 }
 0x208   :  { %v1162_v8 = vrot.slane %v1161_v49, 2  ;;  %v1066_v34 = vmul.f32 1.442695, %v1035_v40  ;;  %v1244_v21 = vadd.f32 %v1243_v10, %v1242_v47  ;;  %v1231_v6 = vrot.slane %v1230_v15, 1 }
 0x209   :  { %v1034_v52 = vsub.f32 %v2307_v1, %v1012_v12  ;;  %v1237_v54 = vadd.f32 %v1236_v63, %v1235_v56  ;;  %v1250_v28 = vrot.slane %v1249_v17, 2  ;;  %v1195_v59 = vmul.f32 %v1741_v0, %v2268_v19 }
 0x20a   :  { %v1163_v37 = vadd.f32 %v1162_v8, %v1161_v49  ;;  %1748 = vpow2.f32 %v1066_v34  ;;  %v1224_v30 = vrot.slane %v1223_v20, 1  ;;  %v1151_v23 = vadd.f32 %v1150_v57, %v1149_v61 }
 0x20b   :  { %v1064_v50 = vmul.f32 1.442695, %v1034_v52  ;;  %v2334_v31 = vpop.eup %1742  ;;  %v1245_v1 = vrot.slane %v1244_v21, 1  ;;  %v1218_v43 = vadd.f32 %v1217_v18, %v1216_v7  ;;  %v1256_v33 = vadd.f32 %v1255_v25, %v1254_v41 }
 0x20c   :  { %v1164_v14 = vrot.slane %v1163_v37, 1  ;;  %v1152_v51 = vsel %vm907_vm8, %v2334_v31, 0.0  ;;  %v1232_v35 = vadd.f32 %v1231_v6, %v1230_v15  ;;  %v1238_v38 = vrot.slane %v1237_v54, 1 }
 0x20d   :  { %1750 = vpow2.f32 %v1064_v50  ;;  %v1251_v22 = vadd.f32 %v1250_v28, %v1249_v17  ;;  %v1153_v39 = vrot.slane %v1152_v51, 4  ;;  %v1225_v29 = vadd.f32 %v1224_v30, %v1223_v20 }
 0x20e   :  { %1752 = vrcp.f32 %v1144_v13  ;;  %v1257_v45 = vrot.slane %v1256_v33, 2  ;;  %v1261_v19 = vsel %vm907_vm8, %v1195_v59, 0.0  ;;  %v1246_v56 = vadd.f32 %v1245_v1, %v1244_v21 }
 0x20f   :  { %1754 = vrcp.f32 %v1151_v23  ;;  %v1262_v27 = vrot.slane %v1261_v19, 4  ;;  %v1165_v42 = vadd.f32 %v1164_v14, %v1163_v37  ;;  %v1154_v3 = vadd.f32 %v1153_v39, %v1152_v51 }
 0x210   :  { %v1258_v46 = vadd.f32 %v1257_v45, %v1256_v33  ;;  %v1341_v2 = vsel %vm389_vm1, %v1225_v29, %v1218_v43  ;;  %v1239_v47 = vadd.f32 %v1238_v38, %v1237_v54  ;;  %v1252_v48 = vrot.slane %v1251_v22, 1  ;;  %v1745_v55 = vpop.eup %1744 }
 0x211   :  { %v1263_v49 = vadd.f32 %v1262_v27, %v1261_v19  ;;  %v1342_v32 = vsel %vm391_vm2, %v1232_v35, %v1341_v2  ;;  %v1155_v44 = vrot.slane %v1154_v3, 2  ;;  %1756 = vrcp.f32 %v1165_v42 }
 0x212   :  { %v1259_v53 = vrot.slane %v1258_v46, 1  ;;  %v1343_v61 = vsel %vm393_vm3, %v1239_v47, %v1342_v32  ;;  %v1747_v62 = vpop.eup %1746  ;;  %v1253_v5 = vadd.f32 %v1252_v48, %v1251_v22  ;;  %v1199_v54 = vmul.f32 %v1745_v55, %v2281_v26 }
 0x213   :  { %v1264_v24 = vrot.slane %v1263_v49, 2  ;;  %v1156_v0 = vadd.f32 %v1155_v44, %v1154_v3  ;;  %v1344_v4 = vsel %vm395_vm4, %v1246_v56, %v1343_v61  ;;  %v1197_v21 = vmul.f32 %v1747_v62, %v2285_v16 }
 0x214   :  { %v1260_v58 = vadd.f32 %v1259_v53, %v1258_v46  ;;  %v1345_v63 = vsel %vm397_vm5, %v1253_v5, %v1344_v4  ;;  %v1275_v14 = vsel %vm907_vm8, %v1199_v54, 0.0 }
 0x215   :  { %v1265_v10 = vadd.f32 %v1264_v24, %v1263_v49  ;;  %v1157_v8 = vrot.slane %v1156_v0, 1  ;;  %v1268_v30 = vsel %vm907_vm8, %v1197_v21, 0.0  ;;  %v1276_v22 = vrot.slane %v1275_v14, 4 }
 0x216   :  { %v1346_v52 = vsel %vm399_vm6, %v1260_v58, %v1345_v63  ;;  %v1269_v33 = vrot.slane %v1268_v30, 4 }
 0x217   :  { %v2343_v7 = vpop.eup %1748  ;;  %v1266_v40 = vrot.slane %v1265_v10, 1  ;;  %v1158_v41 = vadd.f32 %v1157_v8, %v1156_v0  ;;  %v1277_v42 = vadd.f32 %v1276_v22, %v1275_v14 }
 0x218   :  { %v1173_v15 = vsel %vm907_vm8, %v2343_v7, 0.0  ;;  %v1270_v19 = vadd.f32 %v1269_v33, %v1268_v30 }
 0x219   :  { %v1174_v20 = vrot.slane %v1173_v15, 4  ;;  %v1267_v34 = vadd.f32 %v1266_v40, %v1265_v10  ;;  %1758 = vrcp.f32 %v1158_v41  ;;  %v1278_v49 = vrot.slane %v1277_v42, 2 }
 0x21a   :  { %v2345_v12 = vpop.eup %1750  ;;  %v1271_v2 = vrot.slane %v1270_v19, 2 }
 0x21b   :  { %v1753_v17 = vpop.eup %1752  ;;  %v1166_v57 = vsel %vm907_vm8, %v2345_v12, 0.0  ;;  %v1175_v37 = vadd.f32 %v1174_v20, %v1173_v15  ;;  %v1347_v25 = vsel %vm401_vm7, %v1267_v34, %v1346_v52  ;;  %v1279_v61 = vadd.f32 %v1278_v49, %v1277_v42 }
 0x21c   :  { %v1167_v13 = vrot.slane %v1166_v57, 4  ;;  %v1201_v50 = vmul.f32 %v1753_v17, %v2292_v11  ;;  %v1755_v6 = vpop.eup %1754  ;;  %1674 = vmatprep.mubr.msk.f32.mxu1 %vm907_vm8, %v1347_v25 }
 0x21d   :  { %v1176_v28 = vrot.slane %v1175_v37, 2  ;;  %v1203_v11 = vmul.f32 %v1755_v6, %v2287_v36  ;;  %v1280_v40 = vrot.slane %v1279_v61, 1 }
 0x21e   :  { %v1168_v18 = vadd.f32 %v1167_v13, %v1166_v57  ;;  %v1282_v1 = vsel %vm907_vm8, %v1201_v50, 0.0  ;;  %v1757_v43 = vpop.eup %1756 }
 0x21f   :  { %v1177_v23 = vadd.f32 %v1176_v28, %v1175_v37  ;;  %v1283_v38 = vrot.slane %v1282_v1, 4  ;;  %v1289_v29 = vsel %vm907_vm8, %v1203_v11, 0.0  ;;  %v1207_v45 = vmul.f32 %v1757_v43, %v2324_v9 }
 0x220   :  { %v1169_v59 = vrot.slane %v1168_v18, 2  ;;  %v1290_v3 = vrot.slane %v1289_v29, 4  ;;  %v1272_v9 = vadd.f32 %v1271_v2, %v1270_v19  ;;  %v1281_v50 = vadd.f32 %v1280_v40, %v1279_v61  ;;  %v1441_v19 = vld [vmem:[%s2404_s4 + $0x8] sm:$0xff]  ;;  %v1591_v2 = vld [vmem:[%s2405_s5] ss:$0 sm:$0xff] }
 0x221   :  { %v1178_v51 = vrot.slane %v1177_v23, 1  ;;  %v1284_v56 = vadd.f32 %v1283_v38, %v1282_v1  ;;  %v1303_v36 = vsel %vm907_vm8, %v1207_v45, 0.0  ;;  %v1442_v45 = vld [vmem:[%s2404_s4 + $0x10] sm:$0xff] }
 0x222   :  { %v1170_v16 = vadd.f32 %v1169_v59, %v1168_v18  ;;  %v1291_v32 = vadd.f32 %v1290_v3, %v1289_v29  ;;  %v1304_v44 = vrot.slane %v1303_v36, 4  ;;  %v1273_v5 = vrot.slane %v1272_v9, 1 }
 0x223   :  { %v1179_v26 = vadd.f32 %v1178_v51, %v1177_v23  ;;  %v1285_v47 = vrot.slane %v1284_v56, 2 }
 0x224   :  { %v1171_v35 = vrot.slane %v1170_v16, 1  ;;  %v1292_v62 = vrot.slane %v1291_v32, 2  ;;  %v1305_v58 = vadd.f32 %v1304_v44, %v1303_v36  ;;  %v1274_v57 = vadd.f32 %v1273_v5, %v1272_v9 }
 0x225   :  { %1760 = vrcp.f32 %v1179_v26  ;;  %v1286_v24 = vadd.f32 %v1285_v47, %v1284_v56  ;;  %v1440_v56 = vld [vmem:[%s2404_s4] sm:$0xff]  ;;  %s1839_s4 = smov [#allocation7]  }
 0x226   :  { %v1172_v39 = vadd.f32 %v1171_v35, %v1170_v16  ;;  %v1759_v27 = vpop.eup %1758  ;;  %v1293_v17 = vadd.f32 %v1292_v62, %v1291_v32  ;;  %v1306_v41 = vrot.slane %v1305_v58, 2  ;;  %v1348_v28 = vsel %vm389_vm1, %v1281_v50, %v1274_v57  ;;  %s1558_s5 = sshll.u32 %s1839_s4, 4  ;;  %s1559_s5 = int_to_ptr.vmem [resolvable:$true] %s1558_s5 }
 0x227   :  { %v1205_v46 = vmul.f32 %v1759_v27, %v2334_v31  ;;  %v1287_v8 = vrot.slane %v1286_v24, 1  ;;  %v1639_v27 = vpop.f32.mrf.mxu1  ;;  %s1804_s22 = scalar_lea.vmem %s1559_s5, 32  ;;  %p1809_p11 = scmp.lt.s32.totalorder %s1559_s5, %s1559_s5 }
 0x228   :  { %1762 = vrcp.f32 %v1172_v39  ;;  %v1294_v18 = vrot.slane %v1293_v17, 1  ;;  %v1307_v25 = vadd.f32 %v1306_v41, %v1305_v58  ;;  %p1805_p10 = scmp.ne.s32.totalorder %s1559_s5, %s1804_s22  ;;  %p1810_p12 = scmp.lt.s32.totalorder %s1804_s22, %s1804_s22 }
 0x229   :  { %v1296_v48 = vsel %vm907_vm8, %v1205_v46, 0.0  ;;  %v1288_v34 = vadd.f32 %v1287_v8, %v1286_v24 }
 0x22a   :  { %v1297_v53 = vrot.slane %v1296_v48, 4  ;;  %v1295_v23 = vadd.f32 %v1294_v18, %v1293_v17  ;;  %v1308_v1 = vrot.slane %v1307_v25, 1  ;;  %p1811_p13 = por %p1810_p12, %p1809_p11 }
 0x22b   :  { %v1349_v30 = vsel %vm391_vm2, %v1288_v34, %v1348_v28 }
 0x22c   :  { %v1298_v55 = vadd.f32 %v1297_v53, %v1296_v48  ;;  %v1350_v51 = vsel %vm393_vm3, %v1295_v23, %v1349_v30  ;;  %v1309_v35 = vadd.f32 %v1308_v1, %v1307_v25  ;;  %p1812_p0 = pnand %p1811_p13, %p1805_p10 }
 0x22e   :  { %v1299_v0 = vrot.slane %v1298_v55, 2 }
 0x230   :  { %v1300_v15 = vadd.f32 %v1299_v0, %v1298_v55 }
 0x232   :  { %v1761_v4 = vpop.eup %1760  ;;  %v1301_v21 = vrot.slane %v1300_v15, 1 }
 0x233   :  { %v1211_v31 = vmul.f32 %v1761_v4, %v2343_v7 }
 0x235   :  { %v1763_v10 = vpop.eup %1762  ;;  %v1317_v20 = vsel %vm907_vm8, %v1211_v31, 0.0 }
 0x236   :  { %v1209_v63 = vmul.f32 %v1763_v10, %v2345_v12  ;;  %v1318_v13 = vrot.slane %v1317_v20, 4  ;;  %v1302_v12 = vadd.f32 %v1301_v21, %v1300_v15 }
 0x238   :  { %v1310_v52 = vsel %vm907_vm8, %v1209_v63, 0.0  ;;  %v1319_v7 = vadd.f32 %v1318_v13, %v1317_v20  ;;  %v1351_v33 = vsel %vm395_vm4, %v1302_v12, %v1350_v51 }
 0x239   :  { %v1311_v37 = vrot.slane %v1310_v52, 4  ;;  %v1352_v22 = vsel %vm397_vm5, %v1309_v35, %v1351_v33 }
 0x23a   :  { %v1320_v54 = vrot.slane %v1319_v7, 2 }
 0x23b   :  { %v1312_v6 = vadd.f32 %v1311_v37, %v1310_v52 }
 0x23c   :  { %v1321_v16 = vadd.f32 %v1320_v54, %v1319_v7 }
 0x23d   :  { %v1313_v59 = vrot.slane %v1312_v6, 2 }
 0x23e   :  { %v1322_v11 = vrot.slane %v1321_v16, 1 }
 0x23f   :  { %v1314_v14 = vadd.f32 %v1313_v59, %v1312_v6 }
 0x240   :  { %v1323_v26 = vadd.f32 %v1322_v11, %v1321_v16 }
 0x241   :  { %v1315_v43 = vrot.slane %v1314_v14, 1 }
 0x243   :  { %v1316_v38 = vadd.f32 %v1315_v43, %v1314_v14 }
 0x245   :  { %v1353_v39 = vsel %vm399_vm6, %v1316_v38, %v1352_v22 }
 0x246   :  { %v1354_v29 = vsel %vm401_vm7, %v1323_v26, %v1353_v39 }
 0x247   :  { %1675 = vmatmul.mubr.msk.f32.vlgmr.msra.gmra.mxu1 %vm907_vm8, %v1354_v29 }
 0x248   :  { %1678 = vmatpush3.msra.mxu1 %v2312_v60  ;;  %v364_v60 = vpop.f32.mrf.mxu1 }
 0x249   :  { %1679 = vmatprep.subr.mxu1 %v1442_v45 }
 0x24a   :  { %1680 = vmatpush3.msra.mxu1 %v1442_v45 }
 0x24b   :  { %1681 = vmatprep.subr.mxu1 %v1441_v19 }
 0x24c   :  { %1682 = vmatpush3.msra.mxu1 %v1441_v19 }
 0x24d   :  { %1683 = vmatprep.subr.mxu1 %v1440_v56 }
 0x24e   :  { %1684 = vmatpush3.msra.mxu1 %v1440_v56 }
 0x307   :  { %v1676_v42 = vpop.f32.mrf.mxu1 }
 0x308   :  { %v1439_v46 = vmul.f32 %v1676_v42, %v1639_v27 }
 0x309   :  { %v1429_v3 = vpop.f32.mrf.mxu1 }
 0x30a   :  { %v1438_v36 = vmul.f32 %v1429_v3, %v364_v60 }
 0x30c   :  { %1685 = vmatprep.mubr.msk.f32.mxu1 %vm76_vm0, %v1438_v36 }
 0x30d   :  { %1686 = vmatmul.mubr.msk.f32.vlgmr.msra.gmra.mxu1 %vm76_vm0, %v1439_v46 }
 0x3cd   :  { %v1687_v47 = vpop.f32.mrf.mxu1 }
 0x3ce   :  { %v1529_v48 = vadd.f32 %v1687_v47, %v1591_v2 }
 0x3cf   :  { %v1523_v49 = vpop.f32.mrf.mxu1 }
 0x3d0   :  { %v1539_v32 = vsel %vm76_vm0, %v1529_v48, -inf  ;;  %v1524_v44 = vadd.f32 %v1591_v2, %v1523_v49 }
 0x3d1   :  { %v1540_v53 = vrot.slane %v1539_v32, 4 }
 0x3d2   :  { %v1532_v9 = vsel %vm76_vm0, %v1524_v44, -inf }
 0x3d3   :  { %v1541_v55 = vmax.f32 %v1539_v32, %v1540_v53  ;;  %v1533_v24 = vrot.slane %v1532_v9, 4 }
 0x3d5   :  { %v1542_v61 = vrot.slane %v1541_v55, 2  ;;  %v1534_v62 = vmax.f32 %v1532_v9, %v1533_v24 }
 0x3d7   :  { %v1543_v0 = vmax.f32 %v1541_v55, %v1542_v61  ;;  %v1535_v58 = vrot.slane %v1534_v62, 2 }
 0x3d9   :  { %v1544_v4 = vrot.slane %v1543_v0, 1  ;;  %v1536_v5 = vmax.f32 %v1534_v62, %v1535_v58 }
 0x3db   :  { %v1537_v10 = vrot.slane %v1536_v5, 1  ;;  %v1545_v31 = vmax.f32 %v1543_v0, %v1544_v4 }
 0x3dd   :  { %v1538_v8 = vmax.f32 %v1536_v5, %v1537_v10 }
 0x3df   :  { %v1548_v15 = vsel %vm389_vm1, %v1545_v31, %v1538_v8 }
 0x3e0   :  { %1551 = vst.msk [vmem:[#allocation7] sm:$0x3] %vm1550_vm10, %v1548_v15 }
 0x3e1   :  { %1815 = shalt.err (!%p1812_p0)
}
 0x3e2   :  { %1561 = dma.vmem_to_hbm [thread:$0]  %s1559_s5, 32, %s2408_s8, [#allocation4]  }
 0x3e3   :  { %1828 = dma.done.wait [#allocation4], 32  }
 0x3e4   :  { %1829 = vsyncadd [#allocation4], 4294967264 }
 0x3e5   :  { %1565 = vsyncpa [#allocation3], 1 }
 0x3e6   :  { %1566 = vsyncpa [#allocation6], 1 }
 0x3e7   :  { %1567 = vsyncpa [#allocation4], 1 }

</bundles_post_ra>
